<compile_context>
chip_gen: v7x
topology: tpu7x:2x2x1
jax: 0.10.0
libtpu: 0.0.40
codegen_flags: <defaults>
</compile_context>

<pallas_src>
import functools

import jax
import jax.numpy as jnp
from jax.experimental import pallas as pl
from jax.experimental.pallas import tpu as pltpu

_INV_SQRT2 = 0.7071067811865476


def _gelu_exact(z):
    # exact (erf-based) GELU, matching torch.nn.functional.gelu default
    return 0.5 * z * (1.0 + jax.lax.erf(z * _INV_SQRT2))


def _dot_x_wT(x_tile, w_tile):
    # x_tile: (tm, tk), w_tile: (tn, tk)  ->  (tm, tn), contracting last dims.
    return jax.lax.dot_general(
        x_tile, w_tile,
        dimension_numbers=(((1,), (1,)), ((), ())),
        preferred_element_type=jnp.float32,
    )


def _kernel_single_k(x_ref, w_ref, b_ref, o_ref, *, inv_divisor):
    """K fits in one tile: no accumulator, no predicated prologue/epilogue."""
    z = _dot_x_wT(x_ref[...], w_ref[...])
    z = (z + b_ref[...].astype(jnp.float32)) * inv_divisor
    o_ref[...] = _gelu_exact(z).astype(o_ref.dtype)


def _kernel_multi_k(x_ref, w_ref, b_ref, o_ref, acc_ref, *, inv_divisor):
    """Grid axis 2 reduces over K into a VMEM f32 accumulator."""
    k = pl.program_id(2)

    @pl.when(k == 0)
    def _():
        acc_ref[...] = jnp.zeros_like(acc_ref)

    acc_ref[...] += _dot_x_wT(x_ref[...], w_ref[...])

    @pl.when(k == pl.num_programs(2) - 1)
    def _():
        z = (acc_ref[...] + b_ref[...].astype(jnp.float32)) * inv_divisor
        o_ref[...] = _gelu_exact(z).astype(o_ref.dtype)


def _pick_tile(dim, candidates):
    """Largest candidate that exactly divides dim, else the full dim."""
    for c in candidates:
        if c <= dim and dim % c == 0:
            return c
    return dim


def linear_div_gelu(x, weight, bias, divisor, *, tm=None, tn=None, tk=None):
    """x: (B, K) f32; weight: (N, K) f32; bias: (N,) f32. Returns (B, N) f32."""
    B, K = x.shape
    N, K2 = weight.shape
    assert K == K2 and bias.shape == (N,)

    # Tile selection: big tiles to amortize grid-step overhead and fill the MXU.
    if tm is None:
        tm = _pick_tile(B, (256, 128, 64, 32, 16, 8))
    if tn is None:
        tn = _pick_tile(N, (512, 256, 128))
    if tk is None:
        tk = _pick_tile(K, (1024, 512, 256, 128))
    assert B % tm == 0 and N % tn == 0 and K % tk == 0

    # Megacore: keep at least one parallel grid axis with >= 2 steps when the
    # shapes allow it, so the two TensorCores both get work.
    if B // tm == 1 and N // tn == 1:
        for c in (256, 128):
            if c < tn and N % c == 0:
                tn = c
                break

    kt = K // tk
    inv_div = 1.0 / float(divisor)
    b2 = bias.reshape(1, N)

    # VMEM budget: double-buffered x/w/bias/out tiles (+ f32 acc for multi-K).
    tile_bytes = 2 * (tm * tk + tn * tk + tn + tm * tn) * 4
    if kt > 1:
        tile_bytes += tm * tn * 4
    vmem_limit = min(max(2 * tile_bytes, 16 * 1024 * 1024), 32 * 1024 * 1024)

    if kt == 1:
        # Fast path: 2-D grid, no accumulator scratch.
        return pl.pallas_call(
            functools.partial(_kernel_single_k, inv_divisor=inv_div),
            out_shape=jax.ShapeDtypeStruct((B, N), x.dtype),
            grid_spec=pltpu.PrefetchScalarGridSpec(
                num_scalar_prefetch=0,
                grid=(B // tm, N // tn),
                in_specs=[
                    pl.BlockSpec((tm, K), lambda i, j: (i, 0)),    # x tile
                    pl.BlockSpec((tn, K), lambda i, j: (j, 0)),    # weight tile (N,K)
                    pl.BlockSpec((1, tn), lambda i, j: (0, j)),    # bias tile
                ],
                out_specs=pl.BlockSpec((tm, tn), lambda i, j: (i, j)),
            ),
            compiler_params=pltpu.CompilerParams(
                dimension_semantics=("parallel", "parallel"),
                vmem_limit_bytes=vmem_limit,
            ),
        )(x, weight, b2)

    # General path: 3-D grid with K-reduction accumulator (reduction axis last).
    return pl.pallas_call(
        functools.partial(_kernel_multi_k, inv_divisor=inv_div),
        out_shape=jax.ShapeDtypeStruct((B, N), x.dtype),
        grid_spec=pltpu.PrefetchScalarGridSpec(
            num_scalar_prefetch=0,
            grid=(B // tm, N // tn, kt),
            in_specs=[
                pl.BlockSpec((tm, tk), lambda i, j, k: (i, k)),    # x tile
                pl.BlockSpec((tn, tk), lambda i, j, k: (j, k)),    # weight tile (N,K)
                pl.BlockSpec((1, tn), lambda i, j, k: (0, j)),     # bias tile
            ],
            out_specs=pl.BlockSpec((tm, tn), lambda i, j, k: (i, j)),
            scratch_shapes=[pltpu.VMEM((tm, tn), jnp.float32)],
        ),
        compiler_params=pltpu.CompilerParams(
            dimension_semantics=("parallel", "parallel", "arbitrary"),
            vmem_limit_bytes=vmem_limit,
        ),
    )(x, weight, b2)


def reference(x, weight, bias, divisor):
    z = (x @ weight.T + bias) / divisor
    return 0.5 * z * (1.0 + jax.lax.erf(z * _INV_SQRT2))


def _make_inputs(key, batch, input_size, output_size):
    kx, kw, kb = jax.random.split(key, 3)
    x = jax.random.normal(kx, (batch, input_size), dtype=jnp.float32)
    # deterministic init mimicking nn.Linear's uniform(-1/sqrt(K), 1/sqrt(K))
    bound = 1.0 / float(input_size) ** 0.5
    weight = jax.random.uniform(
        kw, (output_size, input_size), minval=-bound, maxval=bound, dtype=jnp.float32
    )
    bias = jax.random.uniform(
        kb, (output_size,), minval=-bound, maxval=bound, dtype=jnp.float32
    )
    return x, weight, bias


if __name__ == "__main__":
    divisor = 10.0
    key = jax.random.PRNGKey(0)
    k1, k2 = jax.random.split(key)

    # Case 1: module's shipped dims (input_size=512, output_size=1024), batch=128.
    # Exercises the single-K-step fast path (K=512 fits in one tk tile).
    x, w, b = _make_inputs(k1, 128, 512, 1024)
    out = jax.block_until_ready(linear_div_gelu(x, w, b, divisor))
    ref = jax.block_until_ready(reference(x, w, b, divisor))
    assert out.shape == (128, 1024)
    assert jnp.allclose(out, ref, atol=1e-5, rtol=1e-5)

    # Case 2: deeper K — exercises the 3-D grid / accumulator path (K//tk > 1).
    x2, w2, b2 = _make_inputs(k2, 64, 2048, 512)
    out2 = jax.block_until_ready(linear_div_gelu(x2, w2, b2, divisor))
    ref2 = jax.block_until_ready(reference(x2, w2, b2, divisor))
    assert out2.shape == (64, 512)
    assert jnp.allclose(out2, ref2, atol=1e-5, rtol=1e-5)

    print("KERNEL_OK")
</pallas_src>

<mosaic_0001>
module attributes {stable_mosaic.version = 11 : i64} {
  func.func @_kernel_single_k(%arg0: i32, %arg1: i32, %arg2: memref<128x512xf32, #tpu.memory_space<vmem>>, %arg3: memref<512x512xf32, #tpu.memory_space<vmem>>, %arg4: memref<1x512xf32, #tpu.memory_space<vmem>>, %arg5: memref<128x512xf32, #tpu.memory_space<vmem>>) attributes {dimension_semantics = [#tpu.dimension_semantics<parallel>, #tpu.dimension_semantics<parallel>], iteration_bounds = array<i64: 1, 2>, scalar_prefetch = 0 : i64, scratch_operands = 0 : i64, tpu.core_type = #tpu.core_type<tc>, window_params = [{transform_indices = @transform_0, window_bounds = array<i64: 128, 512>}, {transform_indices = @transform_1, window_bounds = array<i64: 512, 512>}, {transform_indices = @transform_2, window_bounds = array<i64: 1, 512>}, {transform_indices = @transform_3, window_bounds = array<i64: 128, 512>}]} {
    %c0 = arith.constant 0 : index
    %c0_0 = arith.constant 0 : index
    %0 = vector.load %arg2[%c0, %c0_0] : memref<128x512xf32, #tpu.memory_space<vmem>>, vector<128x512xf32>
    %c0_1 = arith.constant 0 : index
    %c0_2 = arith.constant 0 : index
    %1 = vector.load %arg3[%c0_1, %c0_2] : memref<512x512xf32, #tpu.memory_space<vmem>>, vector<512x512xf32>
    %cst = arith.constant dense<0.000000e+00> : vector<128x512xf32>
    %2 = tpu.matmul %0, %1, %cst {dimension_numbers = #tpu.dot_dimension_numbers<[1], [1], [0], [0], [0, 0, 1, 0], [], []>} : vector<128x512xf32>, vector<512x512xf32>, vector<128x512xf32> -> vector<128x512xf32>
    %c0_3 = arith.constant 0 : index
    %c0_4 = arith.constant 0 : index
    %3 = vector.load %arg4[%c0_3, %c0_4] : memref<1x512xf32, #tpu.memory_space<vmem>>, vector<1x512xf32>
    %4 = vector.broadcast %3 : vector<1x512xf32> to vector<128x512xf32>
    %5 = arith.addf %2, %4 : vector<128x512xf32>
    %cst_5 = arith.constant 1.000000e-01 : f32
    %6 = vector.broadcast %cst_5 : f32 to vector<128x512xf32>
    %7 = arith.mulf %5, %6 : vector<128x512xf32>
    %cst_6 = arith.constant 5.000000e-01 : f32
    %8 = vector.broadcast %cst_6 : f32 to vector<128x512xf32>
    %9 = arith.mulf %8, %7 : vector<128x512xf32>
    %cst_7 = arith.constant 0.707106769 : f32
    %10 = vector.broadcast %cst_7 : f32 to vector<128x512xf32>
    %11 = arith.mulf %7, %10 : vector<128x512xf32>
    %12 = math.erf %11 : vector<128x512xf32>
    %cst_8 = arith.constant 1.000000e+00 : f32
    %13 = vector.broadcast %cst_8 : f32 to vector<128x512xf32>
    %14 = arith.addf %13, %12 : vector<128x512xf32>
    %15 = arith.mulf %9, %14 : vector<128x512xf32>
    %c0_9 = arith.constant 0 : index
    %c0_10 = arith.constant 0 : index
    %16 = vector.load %arg5[%c0_9, %c0_10] : memref<128x512xf32, #tpu.memory_space<vmem>>, vector<128x512xf32>
    tpu.vector_store %arg5[%c0_9, %c0_10], %15 {strides = array<i32>} : memref<128x512xf32, #tpu.memory_space<vmem>>, vector<128x512xf32>,
    return
  }
  func.func @transform_0(%arg0: i32, %arg1: i32) -> (i32, i32) {
    %c0_i32 = arith.constant 0 : i32
    %c0_i32_0 = arith.constant 0 : i32
    return %arg0, %c0_i32 : i32, i32
  }
  func.func @transform_1(%arg0: i32, %arg1: i32) -> (i32, i32) {
    %c0_i32 = arith.constant 0 : i32
    %c0_i32_0 = arith.constant 0 : i32
    return %arg1, %c0_i32 : i32, i32
  }
  func.func @transform_2(%arg0: i32, %arg1: i32) -> (i32, i32) {
    %c0_i32 = arith.constant 0 : i32
    %c0_i32_0 = arith.constant 0 : i32
    return %c0_i32, %arg1 : i32, i32
  }
  func.func @transform_3(%arg0: i32, %arg1: i32) -> (i32, i32) {
    %c0_i32 = arith.constant 0 : i32
    return %arg0, %arg1 : i32, i32
  }
}

</mosaic_0001>

<bundles_post_ra>
// kernel: tpu_custom_call.1
= control target key start
LH: loop header
LB: loop body
LE: loop exit
PB: predicated region body
PF: predicated region fallthrough
CT: control target
= control target key end

     0   :  { %s3632_s0 = inlined_call_operand.hbm [shape: f32[128,512], index: 0, kind: input, shape index: {}]   ;;  %s3633_s1 = inlined_call_operand.hbm [shape: f32[1024,512], index: 1, kind: input, shape index: {}]   ;;  %s3634_s2 = inlined_call_operand.hbm [shape: f32[1,1024], index: 2, kind: input, shape index: {}]   ;;  %s3635_s3 = inlined_call_operand.hbm [shape: f32[128,1024], index: 3, kind: output, shape index: {}]  }
   0x1   :  { %3646 = sst [smem:[#allocation13_spill]] %s3633_s1 }
   0x2   :  { %8 = vsyncpa [#allocation3], 0 }
   0x3   :  { %9 = vsyncpa [#allocation6], 0 }
   0x4   :  { %11 = vsyncpa [#allocation6 + $0x1], 0 }
   0x5   :  { %12 = vsyncpa [#allocation4], 0 }
   0x6   :  { %14 = vsyncpa [#allocation4 + $0x1], 0  ;;  %s2663_s12 = smov 0   ;;  %s2665_s13 = smov 0  }
   0x7   :  { %s2667_s14 = smov 0   ;;  %s2669_s15 = smov 0  }
   0x8   :  { %s2671_s16 = smov 0   ;;  %s2673_s17 = smov 0  }
   0x9 LB: > { %s29_s18 = sadd.s32 1, %s2628_s16  ;;  %s65_s19 = sadd.s32 1, %s2620_s14  ;;  %s2632_s17 = sphi %s2673_s17, %s20_s17   ;;  %s2628_s16 = sphi %s2671_s16, %s3673_s16   ;;  %s2624_s15 = sphi %s2669_s15, %s3672_s15   ;;  %s2620_s14 = sphi %s2667_s14, %s3671_s14   ;;  %s2616_s13 = sphi %s2665_s13, %s3670_s13   ;;  %s2612_s12 = sphi %s2663_s12, %s3669_s12  }
   0xa   : > { %p30_p0 = scmp.ge.s32.totalorder %s29_s18, 2  ;;  %p72_p1 = scmp.ne.s32.totalorder %s2620_s14, %s2616_s13 }
   0xb   : > { %p73_p2 = scmp.eq.s32.totalorder %s2632_s17, 0  ;;  %p2273_p6 = scmp.lt.s32.totalorder %s2632_s17, 2 }
   0xc   : > { %s3675_s18 = smov (%p30_p0, %s29_s18), 0  ;;  %s173_s22 = sand.u32 1, %s2632_s17  }
   0xd   : > { %3647 = sst [smem:[#allocation12_spill]] %s3675_s18  ;;  %p2703_p3 = por %p73_p2, %p72_p1 }
   0xe   : > { %s62_s21 = ssub.s32 %s2628_s16, %s3675_s18  ;;  %s175_s23 = sand.u32 1, %s2620_s14  }
   0xf   : > { %p63_p5 = scmp.eq.s32.totalorder %s62_s21, 0  ;;  %s1842_s25 = sshll.u32 %s175_s23, 11 }
  0x10   : > { %s1860_s26 = sshll.u32 %s2628_s16, 15  ;;  %s3649_s1 = sld [smem:[#allocation13_spill]] }
  0x11   : > { %s2714_s24 = scalar_select %p63_p5, %s2620_s14, %s65_s19  }
  0x12   : > { %s177_s30 = scalar_lea.vmem [#allocation5], %s1842_s25  ;;  %p2728_p7 = pnand %p2273_p6, %p2703_p3 }
  0x13   : > { %s185_s4 = sshll.u32 %s177_s30, 4  ;;  %s2732_s6 = scalar_lea.sflag [#allocation6], %s173_s22  ;;  %s2724_s4 = int_to_ptr.vmem [resolvable:$true] %s185_s4 }
  0x14   : > { %s3650_s5 = scalar_select %p2728_p7, 1, 0 }
  0x15   : > { %p3640_p9 = pneg %p2728_p7 }
  0x16   : > { %s2722_s29 = scalar_lea.hbm %s3649_s1, %s1860_s26  ;;  %s2463_s10 = scalar_lea.hbm %s3649_s1, 65536 }
  0x17   : > { %s2458_s7 = scalar_lea.hbm %s2722_s29, 32768  ;;  %p2464_p12 = scmp.lt.u32.totalorder %s2722_s29, %s3649_s1 }
  0x18   : > { %p2459_p8 = scmp.ne.s32.totalorder %s2722_s29, %s2458_s7  ;;  %p2465_p13 = scmp.lt.u32.totalorder %s2463_s10, %s2458_s7 }
  0x19   : > { %p2467_p2 = scmp.lt.u32.totalorder %s2458_s7, %s2722_s29 }
  0x1a   : > { %p2461_p10 = pnand %p3640_p9, %p2459_p8  ;;  %p2466_p0 = por %p2465_p13, %p2464_p12 }
  0x1c   : > { %p2462_p11 = pneg %p2461_p10  ;;  %p2468_p3 = por %p2467_p2, %p2466_p0 }
  0x1e   : > { %p2469_p5 = pnand %p2468_p3, %p2462_p11 }
  0x20   : > { %2472 = shalt.err (!%p2469_p5)
}
  0x21   : > { %s2473_s20 = scalar_lea.vmem %s2724_s4, 32768  ;;  %s2634_s21 = smov [#allocation5]  }
  0x22   : > { %p2474_p6 = scmp.ne.s32.totalorder %s2724_s4, %s2473_s20  ;;  %s2478_s22 = sshll.u32 %s2634_s21, 4  ;;  %s2479_s22 = int_to_ptr.vmem [resolvable:$false] %s2478_s22 }
  0x23   : > { %s2480_s25 = scalar_lea.vmem %s2479_s22, 65536  ;;  %p2481_p4 = scmp.lt.s32.totalorder %s2724_s4, %s2479_s22 }
  0x24   : > { %p2476_p8 = pnand %p2474_p6, %p3640_p9  ;;  %p2482_p12 = scmp.lt.s32.totalorder %s2480_s25, %s2473_s20 }
  0x26   : > { %p2477_p10 = pneg %p2476_p8  ;;  %p2483_p13 = por %p2482_p12, %p2481_p4 }
  0x28   : > { %p2484_p0 = pnand %p2483_p13, %p2477_p10 }
  0x2a   : > { %2487 = shalt.err (!%p2484_p0)
}
  0x2b   : > { %s3636_s26 = smov 512   ;;  %s3637_s27 = smov 32  }
  0x2c   : > { %2264 = dma.hbm_to_vmem [thread:$0]  (!%p2728_p7), %s2722_s29, 32768, %s2724_s4, %s2732_s6, %s3636_s26, %s3636_s26, %s3637_s27  }
  0x2d   : > { %s2764_s28 = sadd.s32 4294967295, %s2632_s17   ;;  %s1838_s30 = sadd.s32 4294967294, %s2632_s17  }
  0x2e   : > { %p78_p4 = scmp.ne.s32.totalorder %s2616_s13, %s2612_s12  ;;  %p3639_p11 = scmp.eq.s32.totalorder %s2764_s28, 0 }
  0x2f   : > { %p130_p2 = scmp.eq.s32.totalorder %s2764_s28, 1  ;;  %p136_p3 = scmp.eq.s32.totalorder %s1838_s30, 1 }
  0x30   : > { %p1839_p5 = scmp.ge.s32.totalorder %s2632_s17, 1  ;;  %p2774_p6 = por %p3639_p11, %p78_p4 }
  0x31   : > { %p2781_p8 = por %p130_p2, %p72_p1  ;;  %p2785_p10 = por %p136_p3, %p78_p4 }
  0x32   : > { %s3651_s7 = scalar_select %p2774_p6, 1, 0 }
  0x33   : > { %s3652_s29 = scalar_select %p2781_p8, 1, 0 }
  0x34   : > { %s3653_s4 = scalar_select %p2785_p10, 1, 0 }
  0x35   : > { %p143_p12 = scmp.lt.s32.totalorder %s2632_s17, 3  ;;  %s2637_s9 = smov [#allocation2]  }
  0x36   : > { %s159_s10 = sshll.u32 %s2637_s9, 4  ;;  %s1846_s11 = sshll.u32 %s175_s23, 2  ;;  %s160_s10 = int_to_ptr.vmem [resolvable:$true] %s159_s10 }
  0x37   : > { %p2790_p13 = pnand %p1839_p5, %p143_p12  ;;  %s1861_s19 = sshll.u32 %s2628_s16, 6 }
  0x38   : > { %s199_s20 = scalar_lea.vmem [#allocation7], %s1846_s11  ;;  %s2808_s26 = scalar_lea.hbm %s3634_s2, %s1861_s19 }
  0x39   : > { %s3654_s8 = scalar_select %p2790_p13, 1, 0 }
  0x3a   : > { %p2257_p0 = pneg %p2790_p13  ;;  %s207_s21 = sshll.u32 %s199_s20, 4  ;;  %s2810_s21 = int_to_ptr.vmem [resolvable:$true] %s207_s21 }
  0x3b   : > { %s2488_s27 = scalar_lea.hbm %s3632_s0, 8192 }
  0x3c   : > { %p2801_p1 = pnand %p2257_p0, %p3639_p11  ;;  %p2489_p4 = scmp.ne.s32.totalorder %s3632_s0, %s2488_s27 }
  0x3d   : > { %p2495_p12 = scmp.lt.u32.totalorder %s2488_s27, %s3632_s0 }
  0x3e   : > { %p2490_p2 = pneg %p2801_p1 }
  0x40   : > { %p2491_p3 = pnand %p2490_p2, %p2489_p4 }
  0x42   : > { %p2492_p5 = pneg %p2491_p3 }
  0x44   : > { %p2497_p0 = pnand %p2495_p12, %p2492_p5 }
  0x46   : > { %2500 = shalt.err (!%p2497_p0)
}
  0x47   : > { %s2501_s19 = scalar_lea.vmem %s160_s10, 8192  ;;  %p2509_p8 = scmp.lt.s32.totalorder %s160_s10, %s160_s10 }
  0x48   : > { %p2502_p11 = scmp.ne.s32.totalorder %s160_s10, %s2501_s19  ;;  %p2510_p6 = scmp.lt.s32.totalorder %s2501_s19, %s2501_s19 }
  0x4a   : > { %p2504_p9 = pnand %p2502_p11, %p2490_p2  ;;  %p2511_p13 = por %p2510_p6, %p2509_p8 }
  0x4c   : > { %p2505_p10 = pneg %p2504_p9 }
  0x4e   : > { %p2512_p7 = pnand %p2511_p13, %p2505_p10 }
  0x50   : > { %2515 = shalt.err (!%p2512_p7)
}
  0x51   : > { %s3656_s25 = smov 32   ;;  %s3657_s30 = smov 512  }
  0x52   : > { %2260 = dma.hbm_to_vmem [thread:$0]  (!%p2801_p1), %s3632_s0, 8192, %s160_s10, [#allocation3], %s3657_s30, %s3657_s30, %s3656_s25  }
  0x53   : > { %s2516_s1 = scalar_lea.hbm %s2808_s26, 64  ;;  %p3658_p11 = scmp.ne.s32.totalorder %s3650_s5, 0 }
  0x54   : > { %p2517_p9 = scmp.ne.s32.totalorder %s2808_s26, %s2516_s1  ;;  %s2521_s22 = scalar_lea.hbm %s3634_s2, 128 }
  0x55   : > { %p3659_p6 = pneg %p3658_p11  ;;  %p2522_p10 = scmp.lt.u32.totalorder %s2808_s26, %s3634_s2 }
  0x56   : > { %p2523_p13 = scmp.lt.u32.totalorder %s2521_s22, %s2516_s1  ;;  %p2525_p2 = scmp.lt.u32.totalorder %s2516_s1, %s2808_s26 }
  0x57   : > { %p2519_p8 = pnand %p2517_p9, %p3659_p6 }
  0x58   : > { %p2524_p4 = por %p2523_p13, %p2522_p10 }
  0x59   : > { %p2520_p7 = pneg %p2519_p8 }
  0x5a   : > { %p2526_p3 = por %p2525_p2, %p2524_p4 }
  0x5c   : > { %p2527_p5 = pnand %p2526_p3, %p2520_p7 }
  0x5e   : > { %2530 = shalt.err (!%p2527_p5)
}
  0x5f   : > { %s2531_s10 = scalar_lea.vmem %s2810_s21, 64  ;;  %p3660_p12 = pmov %p3659_p6 }
  0x60   : > { %p2532_p1 = scmp.ne.s32.totalorder %s2810_s21, %s2531_s10  ;;  %s2638_s19 = smov [#allocation7]  }
  0x61   : > { %s2536_s25 = sshll.u32 %s2638_s19, 4  ;;  %s2537_s25 = int_to_ptr.vmem [resolvable:$false] %s2536_s25 }
  0x62   : > { %p2534_p0 = pnand %p2532_p1, %p3660_p12  ;;  %s2538_s30 = scalar_lea.vmem %s2537_s25, 128 }
  0x63   : > { %p2539_p6 = scmp.lt.s32.totalorder %s2810_s21, %s2537_s25  ;;  %p2540_p8 = scmp.lt.s32.totalorder %s2538_s30, %s2531_s10 }
  0x64   : > { %p2535_p9 = pneg %p2534_p0 }
  0x65   : > { %p2541_p10 = por %p2540_p8, %p2539_p6 }
  0x67   : > { %p2542_p13 = pnand %p2541_p10, %p2535_p9 }
  0x69   : > { %2545 = shalt.err (!%p2542_p13)
}
  0x6a   : > { %2267 = dma.hbm_to_vmem [thread:$0]  (!%p3658_p11), %s2808_s26, 64, %s2810_s21, %s2732_s6  }
  0x6b   : > { %p3661_p7 = scmp.ne.s32.totalorder %s3654_s8, 0 }
  0x6c   : > { %p3662_p4 = scmp.eq.s32.totalorder (!%p3661_p7), %s2764_s28, 0 }
  0x6d   : > { %216 = sbr.rel (%p3661_p7) target bundleno = 736 (0x2e0), region = 32 }
  0x74   : > { %2599 = dma.done.wait (%p3662_p4), [#allocation3], 8192   ;;  %p3663_p2 = pmov %p3662_p4 }
  0x75   : > { %s222_s23 = sand.u32 1, %s2764_s28   ;;  %s2863_s9 = sand.u32 1, %s2616_s13  }
  0x76   : > { %2601 = vsyncadd (%p3663_p2), [#allocation3], 4294959104  ;;  %s1851_s5 = sshll.u32 %s2863_s9, 11  ;;  %s223_s1 = scalar_lea.sflag [#allocation6], %s222_s23 }
  0x77   : > { %s2866_s18 = scalar_lea.vmem [#allocation5], %s1851_s5  ;;  %p3664_p11 = scmp.ne.s32.totalorder %s3651_s7, 0 }
  0x79   : > { %2603 = dma.done.wait (%p3664_p11), %s223_s1, 32832  }
  0x7a   : > { %2605 = vsyncadd (%p3664_p11), %s223_s1, 4294934464  ;;  %v333_v0 = vld [vmem:[%s2866_s18 + $0x8] sm:$0xff]  ;;  %v332_v5 = vld [vmem:[%s2866_s18] sm:$0xff]  ;;  %s1852_s6 = sshll.u32 %s2863_s9, 2  ;;  %s1853_s28 = sshll.u32 %s2863_s9, 9 }
  0x7b   : > { %v337_v1 = vld [vmem:[%s2866_s18 + $0x28] sm:$0xff]  ;;  %v336_v6 = vld [vmem:[%s2866_s18 + $0x20] sm:$0xff]  ;;  %s235_s26 = scalar_lea.vmem [#allocation7], %s1852_s6  ;;  %s3181_s7 = scalar_lea.vmem [#allocation8], %s1853_s28 }
  0x7c   : > { %v461_v2 = vld [vmem:[%s2866_s18 + $0x408] sm:$0xff]  ;;  %v1863_v3 = vpack.c.bf16 %v337_v1, %v333_v0  ;;  %v1865_v8 = vpack.c.bf16 %v336_v6, %v332_v5  ;;  %v460_v9 = vld [vmem:[%s2866_s18 + $0x400] sm:$0xff]  ;;  %s1862_s8 = sshll.u32 %s2624_s15, 9  ;;  %s1719_s21 = sshll.u32 %s3181_s7, 4  ;;  %s3582_s21 = int_to_ptr.vmem [resolvable:$true] %s1719_s21 }
  0x7d   : > { %v465_v4 = vld [vmem:[%s2866_s18 + $0x428] sm:$0xff]  ;;  %v464_v10 = vld [vmem:[%s2866_s18 + $0x420] sm:$0xff]  ;;  %s3580_s11 = scalar_lea.hbm %s3635_s3, %s1862_s8  ;;  %s1703_s20 = scalar_lea.sflag [#allocation4], %s2863_s9 }
  0x7e   : > { %v1991_v7 = vpack.c.bf16 %v465_v4, %v461_v2  ;;  %v341_v11 = vld [vmem:[%s2866_s18 + $0x48] sm:$0xff]  ;;  %1864 = vmatprep.subr.bf16.mxu0 %v1863_v3  ;;  %v1993_v12 = vpack.c.bf16 %v464_v10, %v460_v9  ;;  %v340_v18 = vld [vmem:[%s2866_s18 + $0x40] sm:$0xff]  ;;  %s2546_s15 = scalar_lea.vmem %s3582_s21, 8192  ;;  %p3665_p5 = scmp.ne.s32.totalorder %s3652_s29, 0 }
  0x7f   : > { %v345_v13 = vld [vmem:[%s2866_s18 + $0x68] sm:$0xff]  ;;  %1866 = vmatpush1.bf16.xpose.msra.mxu0 %v1865_v8  ;;  %v344_v19 = vld [vmem:[%s2866_s18 + $0x60] sm:$0xff]  ;;  %p2547_p3 = scmp.ne.s32.totalorder %s3582_s21, %s2546_s15  ;;  %s2639_s10 = smov [#allocation8]  }
  0x80   : > { %v469_v14 = vld [vmem:[%s2866_s18 + $0x448] sm:$0xff]  ;;  %1992 = vmatprep.subr.bf16.mxu1 %v1991_v7  ;;  %v1867_v16 = vpack.c.bf16 %v345_v13, %v341_v11  ;;  %v468_v20 = vld [vmem:[%s2866_s18 + $0x440] sm:$0xff]  ;;  %v1869_v26 = vpack.c.bf16 %v344_v19, %v340_v18  ;;  %s2550_s19 = sshll.u32 %s2639_s10, 4  ;;  %s2551_s19 = int_to_ptr.vmem [resolvable:$false] %s2550_s19 }
  0x81   : > { %v473_v15 = vld [vmem:[%s2866_s18 + $0x468] sm:$0xff]  ;;  %1994 = vmatpush1.bf16.xpose.msra.mxu1 %v1993_v12  ;;  %v472_v21 = vld [vmem:[%s2866_s18 + $0x460] sm:$0xff]  ;;  %p2548_p1 = pnand %p2547_p3, %p3665_p5  ;;  %s2552_s25 = scalar_lea.vmem %s2551_s19, 16384 }
  0x82   : > { %v1995_v17 = vpack.c.bf16 %v473_v15, %v469_v14  ;;  %1868 = vmatprep.subr.bf16.mxu0 %v1867_v16  ;;  %v349_v22 = vld [vmem:[%s2866_s18 + $0x88] sm:$0xff]  ;;  %v1997_v27 = vpack.c.bf16 %v472_v21, %v468_v20  ;;  %v348_v30 = vld [vmem:[%s2866_s18 + $0x80] sm:$0xff]  ;;  %p2553_p0 = scmp.lt.s32.totalorder %s3582_s21, %s2551_s19  ;;  %p2554_p9 = scmp.lt.s32.totalorder %s2552_s25, %s2546_s15 }
  0x83   : > { %v353_v23 = vld [vmem:[%s2866_s18 + $0xa8] sm:$0xff]  ;;  %v352_v31 = vld [vmem:[%s2866_s18 + $0xa0] sm:$0xff]  ;;  %p2549_p12 = pneg %p2548_p1 }
  0x84   : > { %1996 = vmatprep.subr.bf16.mxu1 %v1995_v17  ;;  %v477_v24 = vld [vmem:[%s2866_s18 + $0x488] sm:$0xff]  ;;  %v1871_v28 = vpack.c.bf16 %v353_v23, %v349_v22  ;;  %v476_v32 = vld [vmem:[%s2866_s18 + $0x480] sm:$0xff]  ;;  %v1873_v38 = vpack.c.bf16 %v352_v31, %v348_v30  ;;  %p2555_p6 = por %p2554_p9, %p2553_p0 }
  0x85   : > { %v481_v25 = vld [vmem:[%s2866_s18 + $0x4a8] sm:$0xff]  ;;  %v480_v33 = vld [vmem:[%s2866_s18 + $0x4a0] sm:$0xff] }
  0x86   : > { %v1999_v29 = vpack.c.bf16 %v481_v25, %v477_v24  ;;  %v357_v34 = vld [vmem:[%s2866_s18 + $0xc8] sm:$0xff]  ;;  %v2001_v39 = vpack.c.bf16 %v480_v33, %v476_v32  ;;  %v356_v42 = vld [vmem:[%s2866_s18 + $0xc0] sm:$0xff]  ;;  %p2556_p8 = pnand %p2555_p6, %p2549_p12 }
  0x87   : > { %1870 = vmatpush1.bf16.xpose.msra.mxu0 %v1869_v26  ;;  %v361_v35 = vld [vmem:[%s2866_s18 + $0xe8] sm:$0xff]  ;;  %v360_v43 = vld [vmem:[%s2866_s18 + $0xe0] sm:$0xff] }
  0x88   : > { %1872 = vmatprep.subr.bf16.mxu0 %v1871_v28  ;;  %v485_v36 = vld [vmem:[%s2866_s18 + $0x4c8] sm:$0xff]  ;;  %v1875_v40 = vpack.c.bf16 %v361_v35, %v357_v34  ;;  %v484_v44 = vld [vmem:[%s2866_s18 + $0x4c0] sm:$0xff]  ;;  %v1877_v50 = vpack.c.bf16 %v360_v43, %v356_v42 }
  0x89   : > { %1998 = vmatpush1.bf16.xpose.msra.mxu1 %v1997_v27  ;;  %v489_v37 = vld [vmem:[%s2866_s18 + $0x4e8] sm:$0xff]  ;;  %v488_v45 = vld [vmem:[%s2866_s18 + $0x4e0] sm:$0xff] }
  0x8a   : > { %2000 = vmatprep.subr.bf16.mxu1 %v1999_v29  ;;  %v2003_v41 = vpack.c.bf16 %v489_v37, %v485_v36  ;;  %v365_v46 = vld [vmem:[%s2866_s18 + $0x108] sm:$0xff]  ;;  %v2005_v51 = vpack.c.bf16 %v488_v45, %v484_v44  ;;  %v364_v54 = vld [vmem:[%s2866_s18 + $0x100] sm:$0xff] }
  0x8b   : > { %v369_v47 = vld [vmem:[%s2866_s18 + $0x128] sm:$0xff]  ;;  %v368_v55 = vld [vmem:[%s2866_s18 + $0x120] sm:$0xff] }
  0x8c   : > { %v493_v48 = vld [vmem:[%s2866_s18 + $0x508] sm:$0xff]  ;;  %v1879_v52 = vpack.c.bf16 %v369_v47, %v365_v46  ;;  %v492_v56 = vld [vmem:[%s2866_s18 + $0x500] sm:$0xff]  ;;  %v1881_v62 = vpack.c.bf16 %v368_v55, %v364_v54 }
  0x8d   : > { %v497_v49 = vld [vmem:[%s2866_s18 + $0x528] sm:$0xff]  ;;  %v496_v57 = vld [vmem:[%s2866_s18 + $0x520] sm:$0xff] }
  0x8e   : > { %v2007_v53 = vpack.c.bf16 %v497_v49, %v493_v48  ;;  %v373_v58 = vld [vmem:[%s2866_s18 + $0x148] sm:$0xff]  ;;  %v2009_v63 = vpack.c.bf16 %v496_v57, %v492_v56  ;;  %v372_v2 = vld [vmem:[%s2866_s18 + $0x140] sm:$0xff] }
  0x8f   : > { %1874 = vmatpush1.bf16.xpose.msra.mxu0 %v1873_v38  ;;  %v377_v59 = vld [vmem:[%s2866_s18 + $0x168] sm:$0xff]  ;;  %v376_v3 = vld [vmem:[%s2866_s18 + $0x160] sm:$0xff] }
  0x90   : > { %1876 = vmatprep.subr.bf16.mxu0 %v1875_v40  ;;  %v501_v60 = vld [vmem:[%s2866_s18 + $0x548] sm:$0xff]  ;;  %v1883_v0 = vpack.c.bf16 %v377_v59, %v373_v58  ;;  %v500_v4 = vld [vmem:[%s2866_s18 + $0x540] sm:$0xff]  ;;  %v1885_v10 = vpack.c.bf16 %v376_v3, %v372_v2 }
  0x91   : > { %2002 = vmatpush1.bf16.xpose.msra.mxu1 %v2001_v39  ;;  %v505_v61 = vld [vmem:[%s2866_s18 + $0x568] sm:$0xff]  ;;  %v504_v5 = vld [vmem:[%s2866_s18 + $0x560] sm:$0xff] }
  0x92   : > { %2004 = vmatprep.subr.bf16.mxu1 %v2003_v41  ;;  %v2011_v1 = vpack.c.bf16 %v505_v61, %v501_v60  ;;  %v381_v6 = vld [vmem:[%s2866_s18 + $0x188] sm:$0xff]  ;;  %v2013_v11 = vpack.c.bf16 %v504_v5, %v500_v4  ;;  %v380_v15 = vld [vmem:[%s2866_s18 + $0x180] sm:$0xff] }
  0x93   : > { %v385_v7 = vld [vmem:[%s2866_s18 + $0x1a8] sm:$0xff]  ;;  %v384_v16 = vld [vmem:[%s2866_s18 + $0x1a0] sm:$0xff] }
  0x94   : > { %v509_v8 = vld [vmem:[%s2866_s18 + $0x588] sm:$0xff]  ;;  %v1887_v12 = vpack.c.bf16 %v385_v7, %v381_v6  ;;  %v508_v17 = vld [vmem:[%s2866_s18 + $0x580] sm:$0xff]  ;;  %v1889_v23 = vpack.c.bf16 %v384_v16, %v380_v15 }
  0x95   : > { %v513_v9 = vld [vmem:[%s2866_s18 + $0x5a8] sm:$0xff]  ;;  %v512_v18 = vld [vmem:[%s2866_s18 + $0x5a0] sm:$0xff] }
  0x96   : > { %v2015_v13 = vpack.c.bf16 %v513_v9, %v509_v8  ;;  %v269_v14 = vld [vmem:[#allocation2 + $0x8] sm:$0xff]  ;;  %v2017_v24 = vpack.c.bf16 %v512_v18, %v508_v17  ;;  %v388_v27 = vld [vmem:[%s2866_s18 + $0x1c0] sm:$0xff] }
  0x97   : > { %1878 = vmatpush1.bf16.xpose.msra.mxu0 %v1877_v50  ;;  %674 = vmatprep.mubr.f32.mxu0 %v269_v14  ;;  %v389_v19 = vld [vmem:[%s2866_s18 + $0x1c8] sm:$0xff]  ;;  %v392_v28 = vld [vmem:[%s2866_s18 + $0x1e0] sm:$0xff] }
  0x98   : > { %1880 = vmatprep.subr.bf16.mxu0 %v1879_v52  ;;  %996 = vmatprep.mubr.f32.mxu1 %v269_v14  ;;  %v393_v20 = vld [vmem:[%s2866_s18 + $0x1e8] sm:$0xff]  ;;  %v516_v29 = vld [vmem:[%s2866_s18 + $0x5c0] sm:$0xff]  ;;  %v1893_v35 = vpack.c.bf16 %v392_v28, %v388_v27 }
  0x99   : > { %2006 = vmatpush1.bf16.xpose.msra.mxu1 %v2005_v51  ;;  %v517_v21 = vld [vmem:[%s2866_s18 + $0x5c8] sm:$0xff]  ;;  %v1891_v25 = vpack.c.bf16 %v393_v20, %v389_v19  ;;  %v520_v30 = vld [vmem:[%s2866_s18 + $0x5e0] sm:$0xff] }
  0x9a   : > { %2008 = vmatprep.subr.bf16.mxu1 %v2007_v53  ;;  %v521_v22 = vld [vmem:[%s2866_s18 + $0x5e8] sm:$0xff]  ;;  %v2021_v36 = vpack.c.bf16 %v520_v30, %v516_v29  ;;  %v396_v39 = vld [vmem:[%s2866_s18 + $0x200] sm:$0xff] }
  0x9b   : > { %v2019_v26 = vpack.c.bf16 %v521_v22, %v517_v21  ;;  %v397_v31 = vld [vmem:[%s2866_s18 + $0x208] sm:$0xff]  ;;  %v400_v40 = vld [vmem:[%s2866_s18 + $0x220] sm:$0xff] }
  0x9c   : > { %v401_v32 = vld [vmem:[%s2866_s18 + $0x228] sm:$0xff]  ;;  %v524_v41 = vld [vmem:[%s2866_s18 + $0x600] sm:$0xff]  ;;  %v1897_v47 = vpack.c.bf16 %v400_v40, %v396_v39 }
  0x9d   : > { %v525_v33 = vld [vmem:[%s2866_s18 + $0x608] sm:$0xff]  ;;  %v1895_v37 = vpack.c.bf16 %v401_v32, %v397_v31  ;;  %v528_v42 = vld [vmem:[%s2866_s18 + $0x620] sm:$0xff] }
  0x9e   : > { %v529_v34 = vld [vmem:[%s2866_s18 + $0x628] sm:$0xff]  ;;  %v2025_v48 = vpack.c.bf16 %v528_v42, %v524_v41  ;;  %v404_v51 = vld [vmem:[%s2866_s18 + $0x240] sm:$0xff] }
  0x9f   : > { %1882 = vmatpush1.bf16.xpose.msra.mxu0 %v1881_v62  ;;  %v2023_v38 = vpack.c.bf16 %v529_v34, %v525_v33  ;;  %v405_v43 = vld [vmem:[%s2866_s18 + $0x248] sm:$0xff]  ;;  %v408_v52 = vld [vmem:[%s2866_s18 + $0x260] sm:$0xff] }
  0xa0   : > { %1884 = vmatprep.subr.bf16.mxu0 %v1883_v0  ;;  %v409_v44 = vld [vmem:[%s2866_s18 + $0x268] sm:$0xff]  ;;  %v532_v53 = vld [vmem:[%s2866_s18 + $0x640] sm:$0xff]  ;;  %v1901_v59 = vpack.c.bf16 %v408_v52, %v404_v51 }
  0xa1   : > { %2010 = vmatpush1.bf16.xpose.msra.mxu1 %v2009_v63  ;;  %v533_v45 = vld [vmem:[%s2866_s18 + $0x648] sm:$0xff]  ;;  %v1899_v49 = vpack.c.bf16 %v409_v44, %v405_v43  ;;  %v536_v54 = vld [vmem:[%s2866_s18 + $0x660] sm:$0xff] }
  0xa2   : > { %2012 = vmatprep.subr.bf16.mxu1 %v2011_v1  ;;  %v537_v46 = vld [vmem:[%s2866_s18 + $0x668] sm:$0xff]  ;;  %v2029_v60 = vpack.c.bf16 %v536_v54, %v532_v53  ;;  %v412_v63 = vld [vmem:[%s2866_s18 + $0x280] sm:$0xff] }
  0xa3   : > { %v2027_v50 = vpack.c.bf16 %v537_v46, %v533_v45  ;;  %v413_v55 = vld [vmem:[%s2866_s18 + $0x288] sm:$0xff]  ;;  %v416_v0 = vld [vmem:[%s2866_s18 + $0x2a0] sm:$0xff] }
  0xa4   : > { %v417_v56 = vld [vmem:[%s2866_s18 + $0x2a8] sm:$0xff]  ;;  %v540_v1 = vld [vmem:[%s2866_s18 + $0x680] sm:$0xff]  ;;  %v1905_v7 = vpack.c.bf16 %v416_v0, %v412_v63  ;;  %v335_v63 = vld [vmem:[%s2866_s18 + $0x18] sm:$0xff] }
  0xa5   : > { %v541_v57 = vld [vmem:[%s2866_s18 + $0x688] sm:$0xff]  ;;  %v1903_v61 = vpack.c.bf16 %v417_v56, %v413_v55  ;;  %v544_v2 = vld [vmem:[%s2866_s18 + $0x6a0] sm:$0xff]  ;;  %v339_v0 = vld [vmem:[%s2866_s18 + $0x38] sm:$0xff] }
  0xa6   : > { %v545_v58 = vld [vmem:[%s2866_s18 + $0x6a8] sm:$0xff]  ;;  %v2033_v8 = vpack.c.bf16 %v544_v2, %v540_v1  ;;  %v552_v14 = vld [vmem:[%s2866_s18 + $0x6e0] sm:$0xff]  ;;  %v463_v1 = vld [vmem:[%s2866_s18 + $0x418] sm:$0xff] }
  0xa7   : > { %1886 = vmatpush1.bf16.xpose.msra.mxu0 %v1885_v10  ;;  %v2031_v62 = vpack.c.bf16 %v545_v58, %v541_v57  ;;  %v421_v3 = vld [vmem:[%s2866_s18 + $0x2c8] sm:$0xff]  ;;  %v467_v2 = vld [vmem:[%s2866_s18 + $0x438] sm:$0xff] }
  0xa8   : > { %1888 = vmatprep.subr.bf16.mxu0 %v1887_v12  ;;  %v425_v4 = vld [vmem:[%s2866_s18 + $0x2e8] sm:$0xff]  ;;  %v424_v12 = vld [vmem:[%s2866_s18 + $0x2e0] sm:$0xff] }
  0xa9   : > { %2014 = vmatpush1.bf16.xpose.msra.mxu1 %v2013_v11  ;;  %v549_v5 = vld [vmem:[%s2866_s18 + $0x6c8] sm:$0xff]  ;;  %v1907_v9 = vpack.c.bf16 %v425_v4, %v421_v3  ;;  %v420_v11 = vld [vmem:[%s2866_s18 + $0x2c0] sm:$0xff] }
  0xaa   : > { %2016 = vmatprep.subr.bf16.mxu1 %v2015_v13  ;;  %v553_v6 = vld [vmem:[%s2866_s18 + $0x6e8] sm:$0xff]  ;;  %v548_v13 = vld [vmem:[%s2866_s18 + $0x6c0] sm:$0xff]  ;;  %v1909_v19 = vpack.c.bf16 %v424_v12, %v420_v11  ;;  %v343_v11 = vld [vmem:[%s2866_s18 + $0x58] sm:$0xff] }
  0xab   : > { %v2035_v10 = vpack.c.bf16 %v553_v6, %v549_v5  ;;  %v429_v15 = vld [vmem:[%s2866_s18 + $0x308] sm:$0xff]  ;;  %v2037_v20 = vpack.c.bf16 %v552_v14, %v548_v13  ;;  %v1927_v5 = vpack.c.bf16 %v339_v0, %v335_v63  ;;  %v2055_v6 = vpack.c.bf16 %v467_v2, %v463_v1  ;;  %v347_v12 = vld [vmem:[%s2866_s18 + $0x78] sm:$0xff]  ;;  %v292_v0 = vld [vmem:[#allocation2 + $0xc0] sm:$0xff] }
  0xac   : > { %v433_v16 = vld [vmem:[%s2866_s18 + $0x328] sm:$0xff]  ;;  %v471_v13 = vld [vmem:[%s2866_s18 + $0x458] sm:$0xff] }
  0xad   : > { %v557_v17 = vld [vmem:[%s2866_s18 + $0x708] sm:$0xff]  ;;  %v1911_v21 = vpack.c.bf16 %v433_v16, %v429_v15  ;;  %v475_v14 = vld [vmem:[%s2866_s18 + $0x478] sm:$0xff]  ;;  %v268_v15 = vld [vmem:[#allocation2] sm:$0xff] }
  0xae   : > { %v561_v18 = vld [vmem:[%s2866_s18 + $0x728] sm:$0xff] }
  0xaf   : > { %1890 = vmatpush1.bf16.xpose.msra.mxu0 %v1889_v23  ;;  %v2039_v22 = vpack.c.bf16 %v561_v18, %v557_v17  ;;  %v428_v23 = vld [vmem:[%s2866_s18 + $0x300] sm:$0xff]  ;;  %v437_v27 = vld [vmem:[%s2866_s18 + $0x348] sm:$0xff]  ;;  %v1931_v18 = vpack.c.bf16 %v347_v12, %v343_v11  ;;  %v375_v11 = vld [vmem:[%s2866_s18 + $0x158] sm:$0xff] }
  0xb0   : > { %1892 = vmatprep.subr.bf16.mxu0 %v1891_v25  ;;  %v556_v25 = vld [vmem:[%s2866_s18 + $0x700] sm:$0xff]  ;;  %v441_v28 = vld [vmem:[%s2866_s18 + $0x368] sm:$0xff]  ;;  %v379_v12 = vld [vmem:[%s2866_s18 + $0x178] sm:$0xff] }
  0xb1   : > { %2018 = vmatpush1.bf16.xpose.msra.mxu1 %v2017_v24  ;;  %v432_v24 = vld [vmem:[%s2866_s18 + $0x320] sm:$0xff]  ;;  %v565_v29 = vld [vmem:[%s2866_s18 + $0x748] sm:$0xff]  ;;  %v1915_v33 = vpack.c.bf16 %v441_v28, %v437_v27  ;;  %v351_v27 = vld [vmem:[%s2866_s18 + $0x98] sm:$0xff] }
  0xb2   : > { %2020 = vmatprep.subr.bf16.mxu1 %v2019_v26  ;;  %v560_v26 = vld [vmem:[%s2866_s18 + $0x720] sm:$0xff]  ;;  %v569_v30 = vld [vmem:[%s2866_s18 + $0x768] sm:$0xff]  ;;  %v1913_v31 = vpack.c.bf16 %v432_v24, %v428_v23  ;;  %v346_v23 = vld [vmem:[%s2866_s18 + $0x70] sm:$0xff] }
  0xb3   : > { %v2041_v32 = vpack.c.bf16 %v560_v26, %v556_v25  ;;  %v2043_v34 = vpack.c.bf16 %v569_v30, %v565_v29  ;;  %v445_v39 = vld [vmem:[%s2866_s18 + $0x388] sm:$0xff]  ;;  %v470_v24 = vld [vmem:[%s2866_s18 + $0x450] sm:$0xff]  ;;  %v355_v28 = vld [vmem:[%s2866_s18 + $0xb8] sm:$0xff] }
  0xb4   : > { %v449_v40 = vld [vmem:[%s2866_s18 + $0x3a8] sm:$0xff]  ;;  %v474_v26 = vld [vmem:[%s2866_s18 + $0x470] sm:$0xff]  ;;  %v479_v29 = vld [vmem:[%s2866_s18 + $0x498] sm:$0xff] }
  0xb5   : > { %v573_v41 = vld [vmem:[%s2866_s18 + $0x788] sm:$0xff]  ;;  %v1919_v45 = vpack.c.bf16 %v449_v40, %v445_v39  ;;  %v483_v30 = vld [vmem:[%s2866_s18 + $0x4b8] sm:$0xff]  ;;  %v354_v39 = vld [vmem:[%s2866_s18 + $0xb0] sm:$0xff] }
  0xb6   : > { %v577_v42 = vld [vmem:[%s2866_s18 + $0x7a8] sm:$0xff]  ;;  %v478_v40 = vld [vmem:[%s2866_s18 + $0x490] sm:$0xff] }
  0xb7   : > { %1894 = vmatpush1.bf16.xpose.msra.mxu0 %v1893_v35  ;;  %v436_v35 = vld [vmem:[%s2866_s18 + $0x340] sm:$0xff]  ;;  %v2047_v46 = vpack.c.bf16 %v577_v42, %v573_v41  ;;  %v453_v51 = vld [vmem:[%s2866_s18 + $0x3c8] sm:$0xff]  ;;  %v482_v42 = vld [vmem:[%s2866_s18 + $0x4b0] sm:$0xff] }
  0xb8   : > { %1896 = vmatprep.subr.bf16.mxu0 %v1895_v37  ;;  %v564_v37 = vld [vmem:[%s2866_s18 + $0x740] sm:$0xff]  ;;  %v457_v52 = vld [vmem:[%s2866_s18 + $0x3e8] sm:$0xff] }
  0xb9   : > { %2022 = vmatpush1.bf16.xpose.msra.mxu1 %v2021_v36  ;;  %v440_v36 = vld [vmem:[%s2866_s18 + $0x360] sm:$0xff]  ;;  %v581_v53 = vld [vmem:[%s2866_s18 + $0x7c8] sm:$0xff]  ;;  %v1923_v57 = vpack.c.bf16 %v457_v52, %v453_v51 }
  0xba   : > { %2024 = vmatprep.subr.bf16.mxu1 %v2023_v38  ;;  %v568_v38 = vld [vmem:[%s2866_s18 + $0x760] sm:$0xff]  ;;  %v1917_v43 = vpack.c.bf16 %v440_v36, %v436_v35  ;;  %v585_v54 = vld [vmem:[%s2866_s18 + $0x7e8] sm:$0xff]  ;;  %v2063_v35 = vpack.c.bf16 %v483_v30, %v479_v29  ;;  %v511_v29 = vld [vmem:[%s2866_s18 + $0x598] sm:$0xff] }
  0xbb   : > { %v2045_v44 = vpack.c.bf16 %v568_v38, %v564_v37  ;;  %v2051_v58 = vpack.c.bf16 %v585_v54, %v581_v53  ;;  %v277_v25 = vld [vmem:[#allocation2 + $0x48] sm:$0xff]  ;;  %v350_v37 = vld [vmem:[%s2866_s18 + $0x90] sm:$0xff]  ;;  %v280_v38 = vld [vmem:[#allocation2 + $0x60] sm:$0xff] }
  0xbc   : > { %v281_v36 = vld [vmem:[#allocation2 + $0x68] sm:$0xff]  ;;  %v358_v53 = vld [vmem:[%s2866_s18 + $0xd0] sm:$0xff]  ;;  %v288_v54 = vld [vmem:[#allocation2 + $0xa0] sm:$0xff] }
  0xbd   : > { %v285_v41 = vld [vmem:[#allocation2 + $0x88] sm:$0xff]  ;;  %v515_v30 = vld [vmem:[%s2866_s18 + $0x5b8] sm:$0xff] }
  0xbe   : > { %v289_v52 = vld [vmem:[#allocation2 + $0xa8] sm:$0xff] }
  0xbf   : > { %1898 = vmatpush1.bf16.xpose.msra.mxu0 %v1897_v47  ;;  %v444_v47 = vld [vmem:[%s2866_s18 + $0x380] sm:$0xff] }
  0xc0   : > { %1900 = vmatprep.subr.bf16.mxu0 %v1899_v49  ;;  %v572_v49 = vld [vmem:[%s2866_s18 + $0x780] sm:$0xff] }
  0xc1   : > { %2026 = vmatpush1.bf16.xpose.msra.mxu1 %v2025_v48  ;;  %v448_v48 = vld [vmem:[%s2866_s18 + $0x3a0] sm:$0xff] }
  0xc2   : > { %2028 = vmatprep.subr.bf16.mxu1 %v2027_v50  ;;  %v576_v50 = vld [vmem:[%s2866_s18 + $0x7a0] sm:$0xff]  ;;  %v1921_v55 = vpack.c.bf16 %v448_v48, %v444_v47  ;;  %v1937_v47 = vpack.c.bf16 %v354_v39, %v350_v37  ;;  %v382_v37 = vld [vmem:[%s2866_s18 + $0x190] sm:$0xff] }
  0xc3   : > { %v2049_v56 = vpack.c.bf16 %v576_v50, %v572_v49  ;;  %v284_v48 = vld [vmem:[#allocation2 + $0x80] sm:$0xff]  ;;  %v2065_v49 = vpack.c.bf16 %v482_v42, %v478_v40  ;;  %v386_v39 = vld [vmem:[%s2866_s18 + $0x1b0] sm:$0xff] }
  0xc4   : > { %v510_v40 = vld [vmem:[%s2866_s18 + $0x590] sm:$0xff] }
  0xc5   : > { %v514_v42 = vld [vmem:[%s2866_s18 + $0x5b0] sm:$0xff] }
  0xc7   : > { %1902 = vmatpush1.bf16.xpose.msra.mxu0 %v1901_v59  ;;  %v452_v59 = vld [vmem:[%s2866_s18 + $0x3c0] sm:$0xff] }
  0xc8   : > { %1904 = vmatprep.subr.bf16.mxu0 %v1903_v61  ;;  %v580_v61 = vld [vmem:[%s2866_s18 + $0x7c0] sm:$0xff] }
  0xc9   : > { %2030 = vmatpush1.bf16.xpose.msra.mxu1 %v2029_v60  ;;  %v456_v60 = vld [vmem:[%s2866_s18 + $0x3e0] sm:$0xff] }
  0xca   : > { %2032 = vmatprep.subr.bf16.mxu1 %v2031_v62  ;;  %v584_v62 = vld [vmem:[%s2866_s18 + $0x7e0] sm:$0xff]  ;;  %v1925_v3 = vpack.c.bf16 %v456_v60, %v452_v59  ;;  %v367_v59 = vld [vmem:[%s2866_s18 + $0x118] sm:$0xff] }
  0xcb   : > { %v2053_v4 = vpack.c.bf16 %v584_v62, %v580_v61  ;;  %v371_v60 = vld [vmem:[%s2866_s18 + $0x138] sm:$0xff] }
  0xcc   : > { %v495_v61 = vld [vmem:[%s2866_s18 + $0x518] sm:$0xff]  ;;  %v1943_v2 = vpack.c.bf16 %v371_v60, %v367_v59 }
  0xcd   : > { %v499_v62 = vld [vmem:[%s2866_s18 + $0x538] sm:$0xff] }
  0xce   : > { %v399_v59 = vld [vmem:[%s2866_s18 + $0x218] sm:$0xff] }
  0xcf   : > { %1906 = vmatpush1.bf16.xpose.msra.mxu0 %v1905_v7  ;;  %v334_v7 = vld [vmem:[%s2866_s18 + $0x10] sm:$0xff]  ;;  %v403_v60 = vld [vmem:[%s2866_s18 + $0x238] sm:$0xff] }
  0xd0   : > { %1908 = vmatprep.subr.bf16.mxu0 %v1907_v9  ;;  %v462_v9 = vld [vmem:[%s2866_s18 + $0x410] sm:$0xff] }
  0xd1   : > { %2034 = vmatpush1.bf16.xpose.msra.mxu1 %v2033_v8  ;;  %v338_v8 = vld [vmem:[%s2866_s18 + $0x30] sm:$0xff] }
  0xd2   : > { %2036 = vmatprep.subr.bf16.mxu1 %v2035_v10  ;;  %v466_v10 = vld [vmem:[%s2866_s18 + $0x430] sm:$0xff]  ;;  %v1929_v16 = vpack.c.bf16 %v338_v8, %v334_v7 }
  0xd3   : > { %v2057_v17 = vpack.c.bf16 %v466_v10, %v462_v9  ;;  %v370_v7 = vld [vmem:[%s2866_s18 + $0x130] sm:$0xff]  ;;  %v301_v9 = vld [vmem:[#allocation2 + $0x108] sm:$0xff] }
  0xd4   : > { %v494_v8 = vld [vmem:[%s2866_s18 + $0x510] sm:$0xff] }
  0xd5   : > { %v498_v10 = vld [vmem:[%s2866_s18 + $0x530] sm:$0xff] }
  0xd7   : > { %1910 = vmatpush1.bf16.xpose.msra.mxu0 %v1909_v19  ;;  %v2059_v19 = vpack.c.bf16 %v475_v14, %v471_v13  ;;  %v503_v13 = vld [vmem:[%s2866_s18 + $0x558] sm:$0xff] }
  0xd8   : > { %1912 = vmatprep.subr.bf16.mxu0 %v1911_v21  ;;  %v342_v21 = vld [vmem:[%s2866_s18 + $0x50] sm:$0xff]  ;;  %v507_v14 = vld [vmem:[%s2866_s18 + $0x578] sm:$0xff] }
  0xd9   : > { %2038 = vmatpush1.bf16.xpose.msra.mxu1 %v2037_v20  ;;  %v273_v20 = vld [vmem:[#allocation2 + $0x28] sm:$0xff] }
  0xda   : > { %2040 = vmatprep.subr.bf16.mxu1 %v2039_v22  ;;  %v272_v22 = vld [vmem:[#allocation2 + $0x20] sm:$0xff] }
  0xdf   : > { %1914 = vmatpush1.bf16.xpose.msra.mxu0 %v1913_v31  ;;  %v1933_v31 = vpack.c.bf16 %v346_v23, %v342_v21  ;;  %v374_v21 = vld [vmem:[%s2866_s18 + $0x150] sm:$0xff] }
  0xe0   : > { %1916 = vmatprep.subr.bf16.mxu0 %v1915_v33  ;;  %v2061_v33 = vpack.c.bf16 %v474_v26, %v470_v24  ;;  %v378_v23 = vld [vmem:[%s2866_s18 + $0x170] sm:$0xff] }
  0xe1   : > { %2042 = vmatpush1.bf16.xpose.msra.mxu1 %v2041_v32  ;;  %v276_v32 = vld [vmem:[#allocation2 + $0x40] sm:$0xff]  ;;  %v502_v24 = vld [vmem:[%s2866_s18 + $0x550] sm:$0xff] }
  0xe2   : > { %2044 = vmatprep.subr.bf16.mxu1 %v2043_v34  ;;  %v1935_v34 = vpack.c.bf16 %v355_v28, %v351_v27  ;;  %v506_v26 = vld [vmem:[%s2866_s18 + $0x570] sm:$0xff]  ;;  %v383_v27 = vld [vmem:[%s2866_s18 + $0x198] sm:$0xff] }
  0xe3   : > { %v387_v28 = vld [vmem:[%s2866_s18 + $0x1b8] sm:$0xff] }
  0xe7   : > { %1918 = vmatpush1.bf16.xpose.msra.mxu0 %v1917_v43  ;;  %v359_v43 = vld [vmem:[%s2866_s18 + $0xd8] sm:$0xff] }
  0xe8   : > { %1920 = vmatprep.subr.bf16.mxu0 %v1919_v45  ;;  %v487_v45 = vld [vmem:[%s2866_s18 + $0x4d8] sm:$0xff] }
  0xe9   : > { %2046 = vmatpush1.bf16.xpose.msra.mxu1 %v2045_v44  ;;  %v363_v44 = vld [vmem:[%s2866_s18 + $0xf8] sm:$0xff] }
  0xea   : > { %2048 = vmatprep.subr.bf16.mxu1 %v2047_v46  ;;  %v491_v46 = vld [vmem:[%s2866_s18 + $0x4f8] sm:$0xff]  ;;  %v1939_v50 = vpack.c.bf16 %v363_v44, %v359_v43 }
  0xeb   : > { %v2067_v51 = vpack.c.bf16 %v491_v46, %v487_v45  ;;  %v391_v43 = vld [vmem:[%s2866_s18 + $0x1d8] sm:$0xff] }
  0xec   : > { %v395_v44 = vld [vmem:[%s2866_s18 + $0x1f8] sm:$0xff] }
  0xed   : > { %v519_v45 = vld [vmem:[%s2866_s18 + $0x5d8] sm:$0xff] }
  0xee   : > { %v523_v46 = vld [vmem:[%s2866_s18 + $0x5f8] sm:$0xff] }
  0xef   : > { %1922 = vmatpush1.bf16.xpose.msra.mxu0 %v1921_v55  ;;  %v362_v55 = vld [vmem:[%s2866_s18 + $0xf0] sm:$0xff] }
  0xf0   : > { %1924 = vmatprep.subr.bf16.mxu0 %v1923_v57  ;;  %v293_v57 = vld [vmem:[#allocation2 + $0xc8] sm:$0xff]  ;;  %v1941_v63 = vpack.c.bf16 %v362_v55, %v358_v53  ;;  %v390_v53 = vld [vmem:[%s2866_s18 + $0x1d0] sm:$0xff] }
  0xf1   : > { %2050 = vmatpush1.bf16.xpose.msra.mxu1 %v2049_v56  ;;  %v486_v56 = vld [vmem:[%s2866_s18 + $0x4d0] sm:$0xff] }
  0xf2   : > { %2052 = vmatprep.subr.bf16.mxu1 %v2051_v58  ;;  %v490_v58 = vld [vmem:[%s2866_s18 + $0x4f0] sm:$0xff] }
  0xf3   : > { %v2069_v1 = vpack.c.bf16 %v490_v58, %v486_v56  ;;  %v394_v55 = vld [vmem:[%s2866_s18 + $0x1f0] sm:$0xff] }
  0xf4   : > { %v518_v56 = vld [vmem:[%s2866_s18 + $0x5d0] sm:$0xff] }
  0xf5   : > { %v522_v58 = vld [vmem:[%s2866_s18 + $0x5f0] sm:$0xff] }
  0xf7   : > { %1926 = vmatpush1.bf16.xpose.msra.mxu0 %v1925_v3  ;;  %v2071_v3 = vpack.c.bf16 %v499_v62, %v495_v61  ;;  %v527_v61 = vld [vmem:[%s2866_s18 + $0x618] sm:$0xff] }
  0xf8   : > { %1928 = vmatprep.subr.bf16.mxu0 %v1927_v5  ;;  %v366_v5 = vld [vmem:[%s2866_s18 + $0x110] sm:$0xff]  ;;  %v531_v62 = vld [vmem:[%s2866_s18 + $0x638] sm:$0xff] }
  0xf9   : > { %2054 = vmatpush1.bf16.xpose.msra.mxu1 %v2053_v4  ;;  %v297_v4 = vld [vmem:[#allocation2 + $0xe8] sm:$0xff] }
  0xfa   : > { %2056 = vmatprep.subr.bf16.mxu1 %v2055_v6  ;;  %v296_v6 = vld [vmem:[#allocation2 + $0xe0] sm:$0xff] }
  0xfe   : > { %675 = vmatmul.mubr.f32.vlgmr.msra.gmra.mrb[0].mxu0 %v268_v15 }
  0xff   : > { %1930 = vmatpush1.bf16.xpose.msra.mxu0 %v1929_v16  ;;  %680 = vmatprep.mubr.f32.mxu0 %v273_v20  ;;  %v300_v16 = vld [vmem:[#allocation2 + $0x100] sm:$0xff] }
 0x100   : > { %997 = vmatmul.mubr.f32.vlgmr.msra.gmra.mrb[0].mxu1 %v268_v15  ;;  %1932 = vmatprep.subr.bf16.mxu0 %v1931_v18  ;;  %v1945_v15 = vpack.c.bf16 %v370_v7, %v366_v5  ;;  %v1947_v18 = vpack.c.bf16 %v379_v12, %v375_v11  ;;  %v398_v5 = vld [vmem:[%s2866_s18 + $0x210] sm:$0xff]  ;;  %v407_v11 = vld [vmem:[%s2866_s18 + $0x258] sm:$0xff] }
 0x101   : > { %2058 = vmatpush1.bf16.xpose.msra.mxu1 %v2057_v17  ;;  %1002 = vmatprep.mubr.f32.mxu1 %v273_v20  ;;  %v2073_v17 = vpack.c.bf16 %v498_v10, %v494_v8  ;;  %v305_v20 = vld [vmem:[#allocation2 + $0x128] sm:$0xff]  ;;  %v402_v7 = vld [vmem:[%s2866_s18 + $0x230] sm:$0xff]  ;;  %v411_v12 = vld [vmem:[%s2866_s18 + $0x278] sm:$0xff] }
 0x102   : > { %2060 = vmatprep.subr.bf16.mxu1 %v2059_v19  ;;  %681 = vmatmul.mubr.f32.gmra.mrb[2].mxu0 %v272_v22  ;;  %v2075_v19 = vpack.c.bf16 %v507_v14, %v503_v13  ;;  %v526_v8 = vld [vmem:[%s2866_s18 + $0x610] sm:$0xff]  ;;  %v535_v13 = vld [vmem:[%s2866_s18 + $0x658] sm:$0xff] }
 0x103   : > { %686 = vmatprep.mubr.f32.mxu0 %v277_v25  ;;  %v530_v10 = vld [vmem:[%s2866_s18 + $0x630] sm:$0xff]  ;;  %v539_v14 = vld [vmem:[%s2866_s18 + $0x678] sm:$0xff] }
 0x104   : > { %1003 = vmatmul.mubr.f32.gmra.mrb[2].mxu1 %v272_v22  ;;  %v304_v22 = vld [vmem:[#allocation2 + $0x120] sm:$0xff] }
 0x105   : > { %1008 = vmatprep.mubr.f32.mxu1 %v277_v25  ;;  %v309_v25 = vld [vmem:[#allocation2 + $0x148] sm:$0xff] }
 0x106   : > { %687 = vmatmul.mubr.f32.gmra.mrb[4].mxu0 %v276_v32 }
 0x107   : > { %1934 = vmatpush1.bf16.xpose.msra.mxu0 %v1933_v31  ;;  %692 = vmatprep.mubr.f32.mxu0 %v281_v36  ;;  %v1949_v31 = vpack.c.bf16 %v378_v23, %v374_v21  ;;  %v534_v21 = vld [vmem:[%s2866_s18 + $0x650] sm:$0xff]  ;;  %v415_v23 = vld [vmem:[%s2866_s18 + $0x298] sm:$0xff] }
 0x108   : > { %1009 = vmatmul.mubr.f32.gmra.mrb[4].mxu1 %v276_v32  ;;  %1936 = vmatprep.subr.bf16.mxu0 %v1935_v34  ;;  %v308_v32 = vld [vmem:[#allocation2 + $0x140] sm:$0xff]  ;;  %v1951_v34 = vpack.c.bf16 %v387_v28, %v383_v27 }
 0x109   : > { %2062 = vmatpush1.bf16.xpose.msra.mxu1 %v2061_v33  ;;  %1014 = vmatprep.mubr.f32.mxu1 %v281_v36  ;;  %v2077_v33 = vpack.c.bf16 %v506_v26, %v502_v24  ;;  %v313_v36 = vld [vmem:[#allocation2 + $0x168] sm:$0xff]  ;;  %v419_v24 = vld [vmem:[%s2866_s18 + $0x2b8] sm:$0xff] }
 0x10a   : > { %2064 = vmatprep.subr.bf16.mxu1 %v2063_v35  ;;  %693 = vmatmul.mubr.f32.gmra.mrb[6].mxu0 %v280_v38  ;;  %v2079_v35 = vpack.c.bf16 %v515_v30, %v511_v29  ;;  %v547_v26 = vld [vmem:[%s2866_s18 + $0x6b8] sm:$0xff]  ;;  %v1967_v29 = vpack.c.bf16 %v419_v24, %v415_v23 }
 0x10b   : > { %698 = vmatprep.mubr.f32.mxu0 %v285_v41 }
 0x10c   : > { %1015 = vmatmul.mubr.f32.gmra.mrb[6].mxu1 %v280_v38  ;;  %v312_v38 = vld [vmem:[#allocation2 + $0x160] sm:$0xff] }
 0x10d   : > { %1020 = vmatprep.mubr.f32.mxu1 %v285_v41  ;;  %v317_v41 = vld [vmem:[#allocation2 + $0x188] sm:$0xff] }
 0x10e   : > { %699 = vmatmul.mubr.f32.gmra.mrb[8].mxu0 %v284_v48 }
 0x10f   : > { %1938 = vmatpush1.bf16.xpose.msra.mxu0 %v1937_v47  ;;  %704 = vmatprep.mubr.f32.mxu0 %v289_v52  ;;  %v1953_v47 = vpack.c.bf16 %v386_v39, %v382_v37  ;;  %v551_v37 = vld [vmem:[%s2866_s18 + $0x6d8] sm:$0xff] }
 0x110   : > { %1021 = vmatmul.mubr.f32.gmra.mrb[8].mxu1 %v284_v48  ;;  %1940 = vmatprep.subr.bf16.mxu0 %v1939_v50  ;;  %v316_v48 = vld [vmem:[#allocation2 + $0x180] sm:$0xff]  ;;  %v1955_v50 = vpack.c.bf16 %v395_v44, %v391_v43  ;;  %v422_v43 = vld [vmem:[%s2866_s18 + $0x2d0] sm:$0xff] }
 0x111   : > { %2066 = vmatpush1.bf16.xpose.msra.mxu1 %v2065_v49  ;;  %1026 = vmatprep.mubr.f32.mxu1 %v289_v52  ;;  %v2081_v49 = vpack.c.bf16 %v514_v42, %v510_v40  ;;  %v321_v52 = vld [vmem:[#allocation2 + $0x1a8] sm:$0xff]  ;;  %v426_v44 = vld [vmem:[%s2866_s18 + $0x2f0] sm:$0xff] }
 0x112   : > { %2068 = vmatprep.subr.bf16.mxu1 %v2067_v51  ;;  %705 = vmatmul.mubr.f32.gmra.mrb[10].mxu0 %v288_v54  ;;  %v2083_v51 = vpack.c.bf16 %v523_v46, %v519_v45  ;;  %v550_v45 = vld [vmem:[%s2866_s18 + $0x6d0] sm:$0xff] }
 0x113   : > { %710 = vmatprep.mubr.f32.mxu0 %v293_v57  ;;  %v554_v46 = vld [vmem:[%s2866_s18 + $0x6f0] sm:$0xff] }
 0x114   : > { %1027 = vmatmul.mubr.f32.gmra.mrb[10].mxu1 %v288_v54  ;;  %v320_v54 = vld [vmem:[#allocation2 + $0x1a0] sm:$0xff] }
 0x115   : > { %1032 = vmatprep.mubr.f32.mxu1 %v293_v57  ;;  %v325_v57 = vld [vmem:[#allocation2 + $0x1c8] sm:$0xff] }
 0x116   : > { %711 = vmatmul.mubr.f32.gmra.mrb[12].mxu0 %v292_v0 }
 0x117   : > { %1942 = vmatpush1.bf16.xpose.msra.mxu0 %v1941_v63  ;;  %716 = vmatprep.mubr.f32.mxu0 %v297_v4  ;;  %v1957_v63 = vpack.c.bf16 %v394_v55, %v390_v53  ;;  %v430_v55 = vld [vmem:[%s2866_s18 + $0x310] sm:$0xff] }
 0x118   : > { %1033 = vmatmul.mubr.f32.gmra.mrb[12].mxu1 %v292_v0  ;;  %1944 = vmatprep.subr.bf16.mxu0 %v1943_v2  ;;  %v324_v0 = vld [vmem:[#allocation2 + $0x1c0] sm:$0xff]  ;;  %v1959_v2 = vpack.c.bf16 %v403_v60, %v399_v59  ;;  %v439_v59 = vld [vmem:[%s2866_s18 + $0x358] sm:$0xff] }
 0x119   : > { %2070 = vmatpush1.bf16.xpose.msra.mxu1 %v2069_v1  ;;  %1038 = vmatprep.mubr.f32.mxu1 %v297_v4  ;;  %v2085_v1 = vpack.c.bf16 %v522_v58, %v518_v56  ;;  %v329_v4 = vld [vmem:[#allocation2 + $0x1e8] sm:$0xff]  ;;  %v434_v56 = vld [vmem:[%s2866_s18 + $0x330] sm:$0xff]  ;;  %v443_v60 = vld [vmem:[%s2866_s18 + $0x378] sm:$0xff] }
 0x11a   : > { %2072 = vmatprep.subr.bf16.mxu1 %v2071_v3  ;;  %717 = vmatmul.mubr.f32.gmra.mrb[14].mxu0 %v296_v6  ;;  %v2087_v3 = vpack.c.bf16 %v531_v62, %v527_v61  ;;  %v562_v58 = vld [vmem:[%s2866_s18 + $0x730] sm:$0xff]  ;;  %v567_v61 = vld [vmem:[%s2866_s18 + $0x758] sm:$0xff] }
 0x11b   : > { %722 = vmatprep.mubr.f32.mxu0 %v301_v9  ;;  %v571_v62 = vld [vmem:[%s2866_s18 + $0x778] sm:$0xff] }
 0x11c   : > { %1039 = vmatmul.mubr.f32.gmra.mrb[14].mxu1 %v296_v6  ;;  %v328_v6 = vld [vmem:[#allocation2 + $0x1e0] sm:$0xff] }
 0x11d   : > { %1044 = vmatprep.mubr.f32.mxu1 %v301_v9  ;;  %v271_v9 = vld [vmem:[#allocation2 + $0x18] sm:$0xff] }
 0x11e   : > { %723 = vmatmul.mubr.f32.gmra.mrb[16].mxu0 %v300_v16 }
 0x11f   : > { %1946 = vmatpush1.bf16.xpose.msra.mxu0 %v1945_v15  ;;  %728 = vmatprep.mubr.f32.mxu0 %v305_v20  ;;  %v1961_v15 = vpack.c.bf16 %v402_v7, %v398_v5  ;;  %v566_v5 = vld [vmem:[%s2866_s18 + $0x750] sm:$0xff]  ;;  %v447_v7 = vld [vmem:[%s2866_s18 + $0x398] sm:$0xff] }
 0x120   : > { %1045 = vmatmul.mubr.f32.gmra.mrb[16].mxu1 %v300_v16  ;;  %1948 = vmatprep.subr.bf16.mxu0 %v1947_v18  ;;  %v2089_v16 = vpack.c.bf16 %v530_v10, %v526_v8  ;;  %v2091_v18 = vpack.c.bf16 %v539_v14, %v535_v13  ;;  %v451_v8 = vld [vmem:[%s2866_s18 + $0x3b8] sm:$0xff] }
 0x121   : > { %2074 = vmatpush1.bf16.xpose.msra.mxu1 %v2073_v17  ;;  %1050 = vmatprep.mubr.f32.mxu1 %v305_v20  ;;  %v1963_v17 = vpack.c.bf16 %v411_v12, %v407_v11  ;;  %v410_v20 = vld [vmem:[%s2866_s18 + $0x270] sm:$0xff]  ;;  %v579_v10 = vld [vmem:[%s2866_s18 + $0x7b8] sm:$0xff]  ;;  %v1983_v13 = vpack.c.bf16 %v451_v8, %v447_v7 }
 0x122   : > { %2076 = vmatprep.subr.bf16.mxu1 %v2075_v19  ;;  %729 = vmatmul.mubr.f32.gmra.mrb[18].mxu0 %v304_v22  ;;  %v406_v19 = vld [vmem:[%s2866_s18 + $0x250] sm:$0xff] }
 0x123   : > { %734 = vmatprep.mubr.f32.mxu0 %v309_v25  ;;  %v1965_v27 = vpack.c.bf16 %v410_v20, %v406_v19  ;;  %v455_v19 = vld [vmem:[%s2866_s18 + $0x3d8] sm:$0xff] }
 0x124   : > { %1051 = vmatmul.mubr.f32.gmra.mrb[18].mxu1 %v304_v22  ;;  %v538_v22 = vld [vmem:[%s2866_s18 + $0x670] sm:$0xff]  ;;  %v459_v20 = vld [vmem:[%s2866_s18 + $0x3f8] sm:$0xff] }
 0x125   : > { %1056 = vmatprep.mubr.f32.mxu1 %v309_v25  ;;  %v543_v25 = vld [vmem:[%s2866_s18 + $0x698] sm:$0xff]  ;;  %v2093_v28 = vpack.c.bf16 %v538_v22, %v534_v21 }
 0x126   : > { %735 = vmatmul.mubr.f32.gmra.mrb[20].mxu0 %v308_v32  ;;  %v2095_v30 = vpack.c.bf16 %v547_v26, %v543_v25  ;;  %v583_v21 = vld [vmem:[%s2866_s18 + $0x7d8] sm:$0xff]  ;;  %v1987_v25 = vpack.c.bf16 %v459_v20, %v455_v19 }
 0x127   : > { %1950 = vmatpush1.bf16.xpose.msra.mxu0 %v1949_v31  ;;  %740 = vmatprep.mubr.f32.mxu0 %v313_v36  ;;  %v414_v31 = vld [vmem:[%s2866_s18 + $0x290] sm:$0xff]  ;;  %v587_v22 = vld [vmem:[%s2866_s18 + $0x7f8] sm:$0xff] }
 0x128   : > { %1057 = vmatmul.mubr.f32.gmra.mrb[20].mxu1 %v308_v32  ;;  %1952 = vmatprep.subr.bf16.mxu0 %v1951_v34  ;;  %v418_v32 = vld [vmem:[%s2866_s18 + $0x2b0] sm:$0xff]  ;;  %v2115_v26 = vpack.c.bf16 %v587_v22, %v583_v21 }
 0x129   : > { %2078 = vmatpush1.bf16.xpose.msra.mxu1 %v2077_v33  ;;  %1062 = vmatprep.mubr.f32.mxu1 %v313_v36  ;;  %v542_v33 = vld [vmem:[%s2866_s18 + $0x690] sm:$0xff]  ;;  %v427_v36 = vld [vmem:[%s2866_s18 + $0x2f8] sm:$0xff]  ;;  %v1969_v39 = vpack.c.bf16 %v418_v32, %v414_v31 }
 0x12a   : > { %2080 = vmatprep.subr.bf16.mxu1 %v2079_v35  ;;  %741 = vmatmul.mubr.f32.gmra.mrb[22].mxu0 %v312_v38  ;;  %v546_v34 = vld [vmem:[%s2866_s18 + $0x6b0] sm:$0xff]  ;;  %v423_v35 = vld [vmem:[%s2866_s18 + $0x2d8] sm:$0xff] }
 0x12b   : > { %746 = vmatprep.mubr.f32.mxu0 %v317_v41  ;;  %v2097_v40 = vpack.c.bf16 %v546_v34, %v542_v33  ;;  %v270_v33 = vld [vmem:[#allocation2 + $0x10] sm:$0xff]  ;;  %v275_v34 = vld [vmem:[#allocation2 + $0x38] sm:$0xff] }
 0x12c   : > { %1063 = vmatmul.mubr.f32.gmra.mrb[22].mxu1 %v312_v38  ;;  %v555_v38 = vld [vmem:[%s2866_s18 + $0x6f8] sm:$0xff] }
 0x12d   : > { %1068 = vmatprep.mubr.f32.mxu1 %v317_v41  ;;  %v1971_v41 = vpack.c.bf16 %v427_v36, %v423_v35  ;;  %v2099_v42 = vpack.c.bf16 %v555_v38, %v551_v37  ;;  %v274_v35 = vld [vmem:[#allocation2 + $0x30] sm:$0xff]  ;;  %v279_v36 = vld [vmem:[#allocation2 + $0x58] sm:$0xff] }
 0x12e   : > { %747 = vmatmul.mubr.f32.gmra.mrb[24].mxu0 %v316_v48  ;;  %v278_v37 = vld [vmem:[#allocation2 + $0x50] sm:$0xff]  ;;  %v283_v38 = vld [vmem:[#allocation2 + $0x78] sm:$0xff] }
 0x12f   : > { %1954 = vmatpush1.bf16.xpose.msra.mxu0 %v1953_v47  ;;  %752 = vmatprep.mubr.f32.mxu0 %v321_v52  ;;  %v431_v47 = vld [vmem:[%s2866_s18 + $0x318] sm:$0xff] }
 0x130   : > { %1069 = vmatmul.mubr.f32.gmra.mrb[24].mxu1 %v316_v48  ;;  %1956 = vmatprep.subr.bf16.mxu0 %v1955_v50  ;;  %v435_v48 = vld [vmem:[%s2866_s18 + $0x338] sm:$0xff] }
 0x131   : > { %2082 = vmatpush1.bf16.xpose.msra.mxu1 %v2081_v49  ;;  %1074 = vmatprep.mubr.f32.mxu1 %v321_v52  ;;  %v559_v49 = vld [vmem:[%s2866_s18 + $0x718] sm:$0xff]  ;;  %v2101_v52 = vpack.c.bf16 %v554_v46, %v550_v45  ;;  %v1975_v53 = vpack.c.bf16 %v435_v48, %v431_v47  ;;  %v294_v45 = vld [vmem:[#allocation2 + $0xd0] sm:$0xff] }
 0x132   : > { %2084 = vmatprep.subr.bf16.mxu1 %v2083_v51  ;;  %753 = vmatmul.mubr.f32.gmra.mrb[26].mxu0 %v320_v54  ;;  %v563_v50 = vld [vmem:[%s2866_s18 + $0x738] sm:$0xff]  ;;  %v1973_v51 = vpack.c.bf16 %v426_v44, %v422_v43  ;;  %v290_v43 = vld [vmem:[#allocation2 + $0xb0] sm:$0xff] }
 0x133   : > { %758 = vmatprep.mubr.f32.mxu0 %v325_v57  ;;  %v295_v44 = vld [vmem:[#allocation2 + $0xd8] sm:$0xff]  ;;  %v298_v47 = vld [vmem:[#allocation2 + $0xf0] sm:$0xff] }
 0x134   : > { %1075 = vmatmul.mubr.f32.gmra.mrb[26].mxu1 %v320_v54  ;;  %v2103_v54 = vpack.c.bf16 %v563_v50, %v559_v49  ;;  %v299_v46 = vld [vmem:[#allocation2 + $0xf8] sm:$0xff]  ;;  %v302_v49 = vld [vmem:[#allocation2 + $0x110] sm:$0xff] }
 0x135   : > { %1080 = vmatprep.mubr.f32.mxu1 %v325_v57  ;;  %v558_v57 = vld [vmem:[%s2866_s18 + $0x710] sm:$0xff]  ;;  %v303_v48 = vld [vmem:[#allocation2 + $0x118] sm:$0xff] }
 0x136   : > { %759 = vmatmul.mubr.f32.gmra.mrb[28].mxu0 %v324_v0  ;;  %v307_v50 = vld [vmem:[#allocation2 + $0x138] sm:$0xff] }
 0x137   : > { %1958 = vmatpush1.bf16.xpose.msra.mxu0 %v1957_v63  ;;  %764 = vmatprep.mubr.f32.mxu0 %v329_v4  ;;  %v1977_v63 = vpack.c.bf16 %v434_v56, %v430_v55  ;;  %v314_v55 = vld [vmem:[#allocation2 + $0x170] sm:$0xff]  ;;  %v319_v56 = vld [vmem:[#allocation2 + $0x198] sm:$0xff] }
 0x138   : > { %1081 = vmatmul.mubr.f32.gmra.mrb[28].mxu1 %v324_v0  ;;  %1960 = vmatprep.subr.bf16.mxu0 %v1959_v2  ;;  %v2105_v0 = vpack.c.bf16 %v562_v58, %v558_v57  ;;  %v2107_v2 = vpack.c.bf16 %v571_v62, %v567_v61  ;;  %v318_v57 = vld [vmem:[#allocation2 + $0x190] sm:$0xff]  ;;  %v323_v58 = vld [vmem:[#allocation2 + $0x1b8] sm:$0xff] }
 0x139   : > { %2086 = vmatpush1.bf16.xpose.msra.mxu1 %v2085_v1  ;;  %1086 = vmatprep.mubr.f32.mxu1 %v329_v4  ;;  %v1979_v1 = vpack.c.bf16 %v443_v60, %v439_v59  ;;  %v442_v4 = vld [vmem:[%s2866_s18 + $0x370] sm:$0xff]  ;;  %v327_v60 = vld [vmem:[#allocation2 + $0x1d8] sm:$0xff] }
 0x13a   : > { %2088 = vmatprep.subr.bf16.mxu1 %v2087_v3  ;;  %765 = vmatmul.mubr.f32.gmra.mrb[30].mxu0 %v328_v6  ;;  %v438_v3 = vld [vmem:[%s2866_s18 + $0x350] sm:$0xff]  ;;  %v331_v62 = vld [vmem:[#allocation2 + $0x1f8] sm:$0xff] }
 0x13b   : > { %835 = vmatprep.mubr.f32.mxu0 %v271_v9  ;;  %v1981_v11 = vpack.c.bf16 %v442_v4, %v438_v3  ;;  %v322_v59 = vld [vmem:[#allocation2 + $0x1b0] sm:$0xff]  ;;  %v588_v3 = vld [vmem:[%s235_s26] sm:$0xf] }
 0x13c   : > { %1087 = vmatmul.mubr.f32.gmra.mrb[30].mxu1 %v328_v6  ;;  %v570_v6 = vld [vmem:[%s2866_s18 + $0x770] sm:$0xff] }
 0x13d   : > { %1157 = vmatprep.mubr.f32.mxu1 %v271_v9  ;;  %v575_v9 = vld [vmem:[%s2866_s18 + $0x798] sm:$0xff]  ;;  %v2109_v12 = vpack.c.bf16 %v570_v6, %v566_v5  ;;  %v326_v61 = vld [vmem:[#allocation2 + $0x1d0] sm:$0xff] }
 0x13e   : > { %v2111_v14 = vpack.c.bf16 %v579_v10, %v575_v9 }
 0x13f   : > { %1962 = vmatpush1.bf16.xpose.msra.mxu0 %v1961_v15  ;;  %v446_v15 = vld [vmem:[%s2866_s18 + $0x390] sm:$0xff] }
 0x140   : > { %1964 = vmatprep.subr.bf16.mxu0 %v1963_v17  ;;  %v574_v17 = vld [vmem:[%s2866_s18 + $0x790] sm:$0xff] }
 0x141   : > { %2090 = vmatpush1.bf16.xpose.msra.mxu1 %v2089_v16  ;;  %v450_v16 = vld [vmem:[%s2866_s18 + $0x3b0] sm:$0xff] }
 0x142   : > { %2092 = vmatprep.subr.bf16.mxu1 %v2091_v18  ;;  %v578_v18 = vld [vmem:[%s2866_s18 + $0x7b0] sm:$0xff]  ;;  %v1985_v23 = vpack.c.bf16 %v450_v16, %v446_v15 }
 0x143   : > { %v2113_v24 = vpack.c.bf16 %v578_v18, %v574_v17 }
 0x147   : > { %1966 = vmatpush1.bf16.xpose.msra.mxu0 %v1965_v27  ;;  %v454_v27 = vld [vmem:[%s2866_s18 + $0x3d0] sm:$0xff] }
 0x148   : > { %1968 = vmatprep.subr.bf16.mxu0 %v1967_v29  ;;  %v582_v29 = vld [vmem:[%s2866_s18 + $0x7d0] sm:$0xff] }
 0x149   : > { %2094 = vmatpush1.bf16.xpose.msra.mxu1 %v2093_v28  ;;  %v458_v28 = vld [vmem:[%s2866_s18 + $0x3f0] sm:$0xff] }
 0x14a   : > { %2096 = vmatprep.subr.bf16.mxu1 %v2095_v30  ;;  %v586_v30 = vld [vmem:[%s2866_s18 + $0x7f0] sm:$0xff]  ;;  %v1989_v31 = vpack.c.bf16 %v458_v28, %v454_v27 }
 0x14b   : > { %v2117_v32 = vpack.c.bf16 %v586_v30, %v582_v29 }
 0x14f   : > { %1970 = vmatpush1.bf16.xpose.msra.mxu0 %v1969_v39  ;;  %v282_v39 = vld [vmem:[#allocation2 + $0x70] sm:$0xff] }
 0x150   : > { %1972 = vmatprep.subr.bf16.mxu0 %v1971_v41  ;;  %v286_v41 = vld [vmem:[#allocation2 + $0x90] sm:$0xff] }
 0x151   : > { %2098 = vmatpush1.bf16.xpose.msra.mxu1 %v2097_v40  ;;  %v287_v40 = vld [vmem:[#allocation2 + $0x98] sm:$0xff] }
 0x152   : > { %2100 = vmatprep.subr.bf16.mxu1 %v2099_v42  ;;  %v291_v42 = vld [vmem:[#allocation2 + $0xb8] sm:$0xff] }
 0x157   : > { %1974 = vmatpush1.bf16.xpose.msra.mxu0 %v1973_v51  ;;  %v306_v51 = vld [vmem:[#allocation2 + $0x130] sm:$0xff] }
 0x158   : > { %1976 = vmatprep.subr.bf16.mxu0 %v1975_v53  ;;  %v310_v53 = vld [vmem:[#allocation2 + $0x150] sm:$0xff] }
 0x159   : > { %2102 = vmatpush1.bf16.xpose.msra.mxu1 %v2101_v52  ;;  %v311_v52 = vld [vmem:[#allocation2 + $0x158] sm:$0xff] }
 0x15a   : > { %2104 = vmatprep.subr.bf16.mxu1 %v2103_v54  ;;  %v315_v54 = vld [vmem:[#allocation2 + $0x178] sm:$0xff] }
 0x15f   : > { %1978 = vmatpush1.bf16.xpose.msra.mxu0 %v1977_v63  ;;  %v330_v63 = vld [vmem:[#allocation2 + $0x1f0] sm:$0xff] }
 0x160   : > { %1980 = vmatprep.subr.bf16.mxu0 %v1979_v1 }
 0x161   : > { %2106 = vmatpush1.bf16.xpose.msra.mxu1 %v2105_v0  ;;  %v590_v0 = vlaneseq }
 0x162   : > { %2108 = vmatprep.subr.bf16.mxu1 %v2107_v2 }
 0x163   : > { %v591_v1 = vshrl.u32 %v590_v0, 7 }
 0x165   : > { %v592_v2 = vsub.s32 0, %v591_v1  ;;  %v600_v4 = vsub.s32 2, %v591_v1  ;;  %v596_v5 = vsub.s32 1, %v591_v1  ;;  %v604_v6 = vsub.s32 3, %v591_v1 }
 0x167   : > { %1982 = vmatpush1.bf16.xpose.msra.mxu0 %v1981_v11  ;;  %v3129_v7 = vrot.slane %v588_v3, %v592_v2  ;;  %v3131_v8 = vrot.slane %v588_v3, %v600_v4  ;;  %v3133_v9 = vrot.slane %v588_v3, %v596_v5  ;;  %v3135_v10 = vrot.slane %v588_v3, %v604_v6 }
 0x168   : > { %1984 = vmatprep.subr.bf16.mxu0 %v1983_v13 }
 0x169   : > { %2110 = vmatpush1.bf16.xpose.msra.mxu1 %v2109_v12 }
 0x16a   : > { %2112 = vmatprep.subr.bf16.mxu1 %v2111_v14 }
 0x16f   : > { %1986 = vmatpush1.bf16.xpose.msra.mxu0 %v1985_v23 }
 0x170   : > { %1988 = vmatprep.subr.bf16.mxu0 %v1987_v25 }
 0x171   : > { %2114 = vmatpush1.bf16.xpose.msra.mxu1 %v2113_v24 }
 0x172   : > { %2116 = vmatprep.subr.bf16.mxu1 %v2115_v26 }
 0x177   : > { %1990 = vmatpush1.bf16.xpose.msra.mxu0 %v1989_v31 }
 0x179   : > { %2118 = vmatpush1.bf16.xpose.msra.mxu1 %v2117_v32 }
 0x17e   : > { %836 = vmatmul.mubr.f32.vlgmr.msra.gmra.mrb[0].mxu0 %v270_v33 }
 0x17f   : > { %841 = vmatprep.mubr.f32.mxu0 %v275_v34 }
 0x180   : > { %1158 = vmatmul.mubr.f32.vlgmr.msra.gmra.mrb[0].mxu1 %v270_v33 }
 0x181   : > { %1163 = vmatprep.mubr.f32.mxu1 %v275_v34 }
 0x182   : > { %842 = vmatmul.mubr.f32.gmra.mrb[2].mxu0 %v274_v35 }
 0x183   : > { %847 = vmatprep.mubr.f32.mxu0 %v279_v36 }
 0x184   : > { %1164 = vmatmul.mubr.f32.gmra.mrb[2].mxu1 %v274_v35 }
 0x185   : > { %1169 = vmatprep.mubr.f32.mxu1 %v279_v36 }
 0x186   : > { %848 = vmatmul.mubr.f32.gmra.mrb[4].mxu0 %v278_v37 }
 0x187   : > { %853 = vmatprep.mubr.f32.mxu0 %v283_v38 }
 0x188   : > { %1170 = vmatmul.mubr.f32.gmra.mrb[4].mxu1 %v278_v37 }
 0x189   : > { %1175 = vmatprep.mubr.f32.mxu1 %v283_v38 }
 0x18a   : > { %854 = vmatmul.mubr.f32.gmra.mrb[6].mxu0 %v282_v39 }
 0x18b   : > { %859 = vmatprep.mubr.f32.mxu0 %v287_v40 }
 0x18c   : > { %1176 = vmatmul.mubr.f32.gmra.mrb[6].mxu1 %v282_v39 }
 0x18d   : > { %1181 = vmatprep.mubr.f32.mxu1 %v287_v40 }
 0x18e   : > { %860 = vmatmul.mubr.f32.gmra.mrb[8].mxu0 %v286_v41 }
 0x18f   : > { %865 = vmatprep.mubr.f32.mxu0 %v291_v42 }
 0x190   : > { %1182 = vmatmul.mubr.f32.gmra.mrb[8].mxu1 %v286_v41 }
 0x191   : > { %1187 = vmatprep.mubr.f32.mxu1 %v291_v42 }
 0x192   : > { %866 = vmatmul.mubr.f32.gmra.mrb[10].mxu0 %v290_v43 }
 0x193   : > { %871 = vmatprep.mubr.f32.mxu0 %v295_v44 }
 0x194   : > { %1188 = vmatmul.mubr.f32.gmra.mrb[10].mxu1 %v290_v43 }
 0x195   : > { %1193 = vmatprep.mubr.f32.mxu1 %v295_v44 }
 0x196   : > { %872 = vmatmul.mubr.f32.gmra.mrb[12].mxu0 %v294_v45 }
 0x197   : > { %877 = vmatprep.mubr.f32.mxu0 %v299_v46 }
 0x198   : > { %1194 = vmatmul.mubr.f32.gmra.mrb[12].mxu1 %v294_v45 }
 0x199   : > { %1199 = vmatprep.mubr.f32.mxu1 %v299_v46 }
 0x19a   : > { %878 = vmatmul.mubr.f32.gmra.mrb[14].mxu0 %v298_v47 }
 0x19b   : > { %883 = vmatprep.mubr.f32.mxu0 %v303_v48 }
 0x19c   : > { %1200 = vmatmul.mubr.f32.gmra.mrb[14].mxu1 %v298_v47 }
 0x19d   : > { %1205 = vmatprep.mubr.f32.mxu1 %v303_v48 }
 0x19e   : > { %884 = vmatmul.mubr.f32.gmra.mrb[16].mxu0 %v302_v49 }
 0x19f   : > { %889 = vmatprep.mubr.f32.mxu0 %v307_v50 }
 0x1a0   : > { %1206 = vmatmul.mubr.f32.gmra.mrb[16].mxu1 %v302_v49 }
 0x1a1   : > { %1211 = vmatprep.mubr.f32.mxu1 %v307_v50 }
 0x1a2   : > { %890 = vmatmul.mubr.f32.gmra.mrb[18].mxu0 %v306_v51 }
 0x1a3   : > { %895 = vmatprep.mubr.f32.mxu0 %v311_v52 }
 0x1a4   : > { %1212 = vmatmul.mubr.f32.gmra.mrb[18].mxu1 %v306_v51 }
 0x1a5   : > { %1217 = vmatprep.mubr.f32.mxu1 %v311_v52 }
 0x1a6   : > { %896 = vmatmul.mubr.f32.gmra.mrb[20].mxu0 %v310_v53 }
 0x1a7   : > { %901 = vmatprep.mubr.f32.mxu0 %v315_v54 }
 0x1a8   : > { %1218 = vmatmul.mubr.f32.gmra.mrb[20].mxu1 %v310_v53 }
 0x1a9   : > { %1223 = vmatprep.mubr.f32.mxu1 %v315_v54 }
 0x1aa   : > { %902 = vmatmul.mubr.f32.gmra.mrb[22].mxu0 %v314_v55 }
 0x1ab   : > { %907 = vmatprep.mubr.f32.mxu0 %v319_v56 }
 0x1ac   : > { %1224 = vmatmul.mubr.f32.gmra.mrb[22].mxu1 %v314_v55 }
 0x1ad   : > { %1229 = vmatprep.mubr.f32.mxu1 %v319_v56 }
 0x1ae   : > { %908 = vmatmul.mubr.f32.gmra.mrb[24].mxu0 %v318_v57 }
 0x1af   : > { %913 = vmatprep.mubr.f32.mxu0 %v323_v58 }
 0x1b0   : > { %1230 = vmatmul.mubr.f32.gmra.mrb[24].mxu1 %v318_v57 }
 0x1b1   : > { %1235 = vmatprep.mubr.f32.mxu1 %v323_v58 }
 0x1b2   : > { %914 = vmatmul.mubr.f32.gmra.mrb[26].mxu0 %v322_v59 }
 0x1b3   : > { %919 = vmatprep.mubr.f32.mxu0 %v327_v60 }
 0x1b4   : > { %1236 = vmatmul.mubr.f32.gmra.mrb[26].mxu1 %v322_v59 }
 0x1b5   : > { %1241 = vmatprep.mubr.f32.mxu1 %v327_v60 }
 0x1b6   : > { %920 = vmatmul.mubr.f32.gmra.mrb[28].mxu0 %v326_v61 }
 0x1b7   : > { %925 = vmatprep.mubr.f32.mxu0 %v331_v62 }
 0x1b8   : > { %1242 = vmatmul.mubr.f32.gmra.mrb[28].mxu1 %v326_v61 }
 0x1b9   : > { %1247 = vmatprep.mubr.f32.mxu1 %v331_v62 }
 0x1ba   : > { %926 = vmatmul.mubr.f32.gmra.mrb[30].mxu0 %v330_v63 }
 0x1bc   : > { %1248 = vmatmul.mubr.f32.gmra.mrb[30].mxu1 %v330_v63 }
 0x251   : > { %v837_v11 = vpop.f32.mrb[0].mxu0 }
 0x252   : > { %v2119_v12 = vadd.f32 %v837_v11, %v3129_v7  ;;  %v839_v14 = vpop.f32.mrb[1].mxu0 }
 0x253   : > { %v1159_v13 = vpop.f32.mrb[0].mxu1  ;;  %v2120_v16 = vadd.f32 %v839_v14, %v3133_v9 }
 0x254   : > { %v2151_v15 = vadd.f32 %v1159_v13, %v3131_v8  ;;  %v1161_v17 = vpop.f32.mrb[1].mxu1  ;;  %v1254_v18 = vmul.f32 0.1, %v2119_v12 }
 0x255   : > { %v2152_v19 = vadd.f32 %v1161_v17, %v3135_v10  ;;  %v1255_v21 = vmul.f32 0.1, %v2120_v16  ;;  %v843_v22 = vpop.f32.mrb[2].mxu0 }
 0x256   : > { %v1256_v20 = vmul.f32 0.1, %v2151_v15  ;;  %v1382_v23 = vmul.f32 0.70710677, %v1254_v18  ;;  %v2121_v25 = vadd.f32 %v843_v22, %v3129_v7  ;;  %v845_v31 = vpop.f32.mrb[3].mxu0  ;;  %v1318_v47 = vmul.f32 0.5, %v1254_v18 }
 0x257   : > { %v1257_v24 = vmul.f32 0.1, %v2152_v19  ;;  %v1165_v26 = vpop.f32.mrb[2].mxu1  ;;  %v1383_v28 = vmul.f32 0.70710677, %v1255_v21  ;;  %v2122_v33 = vadd.f32 %v845_v31, %v3133_v9  ;;  %v1319_v60 = vmul.f32 0.5, %v1255_v21 }
 0x258   : > { %v1384_v27 = vmul.f32 0.70710677, %v1256_v20  ;;  %2330 = verf.f32 %v1382_v23  ;;  %v1258_v30 = vmul.f32 0.1, %v2121_v25  ;;  %v2153_v32 = vadd.f32 %v1165_v26, %v3131_v8  ;;  %v1167_v34 = vpop.f32.mrb[3].mxu1 }
 0x259   : > { %v1385_v29 = vmul.f32 0.70710677, %v1257_v24  ;;  %v849_v35 = vpop.f32.mrb[4].mxu0  ;;  %v2154_v37 = vadd.f32 %v1167_v34, %v3135_v10  ;;  %v1259_v41 = vmul.f32 0.1, %v2122_v33  ;;  %v1320_v50 = vmul.f32 0.5, %v1256_v20 }
 0x25a   : > { %2332 = verf.f32 %v1384_v27  ;;  %v1386_v36 = vmul.f32 0.70710677, %v1258_v30  ;;  %v851_v39 = vpop.f32.mrb[5].mxu0  ;;  %v1260_v40 = vmul.f32 0.1, %v2153_v32  ;;  %v2123_v42 = vadd.f32 %v849_v35, %v3129_v7 }
 0x25b   : > { %2334 = verf.f32 %v1383_v28  ;;  %v1171_v38 = vpop.f32.mrb[4].mxu1  ;;  %v3146_v44 = vmul.f32 0.1, %v2154_v37  ;;  %v2124_v46 = vadd.f32 %v851_v39, %v3133_v9  ;;  %v1387_v49 = vmul.f32 0.70710677, %v1259_v41 }
 0x25c   : > { %2336 = verf.f32 %v1385_v29  ;;  %v1173_v43 = vpop.f32.mrb[5].mxu1  ;;  %v2155_v45 = vadd.f32 %v1171_v38, %v3131_v8  ;;  %v1388_v48 = vmul.f32 0.70710677, %v1260_v40  ;;  %v3151_v52 = vmul.f32 0.1, %v2123_v42 }
 0x25d   : > { %2338 = verf.f32 %v1386_v36  ;;  %v1389_v51 = vmul.f32 0.70710677, %v3146_v44  ;;  %v2156_v53 = vadd.f32 %v1173_v43, %v3135_v10  ;;  %v855_v54 = vpop.f32.mrb[6].mxu0  ;;  %v3154_v56 = vmul.f32 0.1, %v2124_v46 }
 0x25e   : > { %2340 = verf.f32 %v1388_v48  ;;  %v1264_v55 = vmul.f32 0.1, %v2155_v45  ;;  %v2125_v57 = vadd.f32 %v855_v54, %v3129_v7  ;;  %v857_v59 = vpop.f32.mrb[7].mxu0  ;;  %v1390_v61 = vmul.f32 0.70710677, %v3151_v52 }
 0x25f   : > { %v1177_v58 = vpop.f32.mrb[6].mxu1  ;;  %2342 = verf.f32 %v1387_v49  ;;  %v3158_v62 = vmul.f32 0.1, %v2156_v53  ;;  %v1321_v0 = vmul.f32 0.5, %v1257_v24  ;;  %v1322_v1 = vmul.f32 0.5, %v1258_v30 }
 0x260   : > { %v1179_v63 = vpop.f32.mrb[7].mxu1  ;;  %2344 = verf.f32 %v1389_v51  ;;  %v1392_v2 = vmul.f32 0.70710677, %v1264_v55  ;;  %v3161_v5 = vmul.f32 0.5, %v1260_v40  ;;  %v1391_v6 = vmul.f32 0.70710677, %v3154_v56 }
 0x261   : > { %v861_v3 = vpop.f32.mrb[8].mxu0  ;;  %2346 = verf.f32 %v1390_v61  ;;  %v1393_v11 = vmul.f32 0.70710677, %v3158_v62  ;;  %v3165_v15 = vmul.f32 0.1, %v2125_v57  ;;  %v2157_v16 = vadd.f32 %v1177_v58, %v3131_v8 }
 0x262   : > { %v2331_v4 = vpop.eup %2330  ;;  %2348 = verf.f32 %v1392_v2  ;;  %v863_v17 = vpop.f32.mrb[9].mxu0  ;;  %v2126_v21 = vadd.f32 %v857_v59, %v3133_v9  ;;  %v2158_v22 = vadd.f32 %v1179_v63, %v3135_v10  ;;  %v1323_v26 = vmul.f32 0.5, %v1259_v41 }
 0x263   : > { %v1183_v12 = vpop.f32.mrb[8].mxu1  ;;  %v1510_v14 = vadd.f32 1.0, %v2331_v4  ;;  %2350 = verf.f32 %v1391_v6  ;;  %v1394_v31 = vmul.f32 0.70710677, %v3165_v15  ;;  %v3175_v32 = vmul.f32 0.1, %v2157_v16 }
 0x264   : > { %v2333_v13 = vpop.eup %2332  ;;  %v3168_v18 = vpop.f32.mrb[9].mxu1  ;;  %2352 = verf.f32 %v1393_v11  ;;  %v3184_v36 = vmul.f32 0.1, %v2126_v21  ;;  %v3186_v37 = vmul.f32 0.1, %v2158_v22  ;;  %v1325_v40 = vmul.f32 0.5, %v3146_v44 }
 0x265   : > { %v2335_v19 = vpop.eup %2334  ;;  %v1512_v20 = vadd.f32 1.0, %v2333_v13  ;;  %v1574_v24 = vmul.f32 %v1510_v14, %v1318_v47  ;;  %v3172_v27 = vpop.f32.mrb[10].mxu0  ;;  %2354 = verf.f32 %v1394_v31  ;;  %v1396_v41 = vmul.f32 0.70710677, %v3175_v32 }
 0x266   : > { %v2337_v23 = vpop.eup %2336  ;;  %v1511_v25 = vadd.f32 1.0, %v2335_v19  ;;  %v3188_v38 = vpop.f32.mrb[11].mxu0  ;;  %v1326_v46 = vmul.f32 0.5, %v3151_v52  ;;  %v1328_v47 = vmul.f32 0.5, %v1264_v55  ;;  %v1395_v48 = vmul.f32 0.70710677, %v3184_v36 }
 0x267   : > { %v2339_v28 = vpop.eup %2338  ;;  %v1576_v29 = vmul.f32 %v1512_v20, %v1320_v50  ;;  %v1513_v30 = vadd.f32 1.0, %v2337_v23  ;;  %v3177_v33 = vpop.f32.mrb[10].mxu1  ;;  %1638 = vst [vmem:[%s3181_s7] sm:$0xff] %v1574_v24  ;;  %2356 = verf.f32 %v1396_v41  ;;  %v1397_v44 = vmul.f32 0.70710677, %v3186_v37 }
 0x268   : > { %v1575_v34 = vmul.f32 %v1511_v25, %v1319_v60  ;;  %v1514_v35 = vadd.f32 1.0, %v2339_v28  ;;  %v3193_v42 = vpop.f32.mrb[11].mxu1  ;;  %v2341_v43 = vpop.eup %2340  ;;  %v2127_v53 = vadd.f32 %v861_v3, %v3129_v7  ;;  %2358 = verf.f32 %v1395_v48 }
 0x269   : > { %1640 = vst [vmem:[%s3181_s7 + $0x10] sm:$0xff] %v1576_v29  ;;  %v1577_v39 = vmul.f32 %v1513_v30, %v1321_v0  ;;  %v3198_v49 = vpop.f32.mrb[12].mxu0  ;;  %v2343_v50 = vpop.eup %2342  ;;  %v1516_v51 = vadd.f32 1.0, %v2341_v43  ;;  %v2159_v55 = vadd.f32 %v1183_v12, %v3131_v8  ;;  %v2128_v59 = vadd.f32 %v863_v17, %v3133_v9 }
 0x26a   : > { %1639 = vst [vmem:[%s3181_s7 + $0x8] sm:$0xff] %v1575_v34  ;;  %v1578_v45 = vmul.f32 %v1514_v35, %v1322_v1  ;;  %v3205_v57 = vpop.f32.mrb[13].mxu0  ;;  %v2345_v58 = vpop.eup %2344  ;;  %v1515_v52 = vadd.f32 1.0, %v2343_v50  ;;  %2360 = verf.f32 %v1397_v44  ;;  %v3213_v1 = vmul.f32 0.1, %v2127_v53 }
 0x26b   : > { %1641 = vst [vmem:[%s3181_s7 + $0x18] sm:$0xff] %v1577_v39  ;;  %v3203_v54 = vpop.f32.mrb[12].mxu1  ;;  %v2347_v61 = vpop.eup %2346  ;;  %v1580_v63 = vmul.f32 %v1516_v51, %v3161_v5  ;;  %v1517_v0 = vadd.f32 1.0, %v2345_v58  ;;  %v3215_v6 = vmul.f32 0.1, %v2159_v55  ;;  %v1327_v5 = vmul.f32 0.5, %v3154_v56 }
 0x26c   : > { %1642 = vst [vmem:[%s3181_s7 + $0x20] sm:$0xff] %v1578_v45  ;;  %v3210_v60 = vpop.f32.mrb[13].mxu1  ;;  %v2349_v2 = vpop.eup %2348  ;;  %v1579_v3 = vmul.f32 %v1515_v52, %v1323_v26  ;;  %v1518_v4 = vadd.f32 1.0, %v2347_v61  ;;  %v3217_v11 = vmul.f32 0.1, %v2128_v59  ;;  %v1329_v24 = vmul.f32 0.5, %v3158_v62 }
 0x26d   : > { %v3219_v12 = vpop.f32.mrb[14].mxu0  ;;  %v2351_v13 = vpop.eup %2350  ;;  %1644 = vst [vmem:[%s3181_s7 + $0x30] sm:$0xff] %v1580_v63  ;;  %v1581_v14 = vmul.f32 %v1517_v0, %v1325_v40  ;;  %v1520_v16 = vadd.f32 1.0, %v2349_v2  ;;  %v1398_v17 = vmul.f32 0.70710677, %v3213_v1  ;;  %v1330_v29 = vmul.f32 0.5, %v3165_v15 }
 0x26e   : > { %v3226_v20 = vpop.f32.mrb[15].mxu0  ;;  %v2353_v21 = vpop.eup %2352  ;;  %1643 = vst [vmem:[%s3181_s7 + $0x28] sm:$0xff] %v1579_v3  ;;  %v1582_v22 = vmul.f32 %v1518_v4, %v1326_v46  ;;  %v1519_v23 = vadd.f32 1.0, %v2351_v13  ;;  %v1400_v25 = vmul.f32 0.70710677, %v3215_v6  ;;  %v2160_v34 = vadd.f32 %v3168_v18, %v3135_v10 }
 0x26f   : > { %v3224_v19 = vpop.f32.mrb[14].mxu1  ;;  %1645 = vst [vmem:[%s3181_s7 + $0x38] sm:$0xff] %v1581_v14  ;;  %v1584_v56 = vmul.f32 %v1520_v16, %v1328_v47  ;;  %v1521_v28 = vadd.f32 1.0, %v2353_v21  ;;  %2362 = verf.f32 %v1398_v17  ;;  %v1399_v31 = vmul.f32 0.70710677, %v3217_v11  ;;  %v2355_v35 = vpop.eup %2354 }
 0x270   : > { %v3231_v26 = vpop.f32.mrb[15].mxu1  ;;  %1646 = vst [vmem:[%s3181_s7 + $0x40] sm:$0xff] %v1582_v22  ;;  %v1583_v30 = vmul.f32 %v1519_v23, %v1327_v5  ;;  %2364 = verf.f32 %v1400_v25  ;;  %v2129_v40 = vadd.f32 %v3172_v27, %v3129_v7  ;;  %v2161_v15 = vadd.f32 %v3177_v33, %v3131_v8 }
 0x271   : > { %v3239_v62 = vpop.f32.mrb[16].mxu0  ;;  %1648 = vst [vmem:[%s3181_s7 + $0x50] sm:$0xff] %v1584_v56  ;;  %v1585_v39 = vmul.f32 %v1521_v28, %v1329_v24  ;;  %v2130_v41 = vadd.f32 %v3188_v38, %v3133_v9  ;;  %v1522_v18 = vadd.f32 1.0, %v2355_v35  ;;  %v1332_v46 = vmul.f32 0.5, %v3175_v32  ;;  %v2357_v27 = vpop.eup %2356 }
 0x272   : > { %v3250_v45 = vpop.f32.mrb[17].mxu0  ;;  %1647 = vst [vmem:[%s3181_s7 + $0x48] sm:$0xff] %v1583_v30  ;;  %2366 = verf.f32 %v1399_v31  ;;  %v3254_v47 = vmul.f32 0.1, %v2160_v34  ;;  %v3259_v50 = vmul.f32 0.1, %v2129_v40  ;;  %v2162_v51 = vadd.f32 %v3193_v42, %v3135_v10  ;;  %v2359_v44 = vpop.eup %2358 }
 0x273   : > { %v3248_v43 = vpop.f32.mrb[16].mxu1  ;;  %1649 = vst [vmem:[%s3181_s7 + $0x58] sm:$0xff] %v1585_v39  ;;  %v3261_v33 = vmul.f32 0.1, %v2161_v15  ;;  %v3263_v38 = vmul.f32 0.1, %v2130_v41  ;;  %v1586_v53 = vmul.f32 %v1522_v18, %v1330_v29  ;;  %v2131_v52 = vadd.f32 %v3198_v49, %v3129_v7 }
 0x274   : > { %v3256_v48 = vpop.f32.mrb[17].mxu1  ;;  %v1524_v32 = vadd.f32 1.0, %v2357_v27  ;;  %v1401_v58 = vmul.f32 0.70710677, %v3254_v47  ;;  %v2361_v59 = vpop.eup %2360  ;;  %v1331_v61 = vmul.f32 0.5, %v3184_v36  ;;  %v1523_v63 = vadd.f32 1.0, %v2359_v44 }
 0x275   : > { %v3270_v55 = vpop.f32.mrb[18].mxu0  ;;  %v1333_v0 = vmul.f32 0.5, %v3186_v37  ;;  %v1402_v2 = vmul.f32 0.70710677, %v3259_v50  ;;  %1650 = vst [vmem:[%s3181_s7 + $0x60] sm:$0xff] %v1586_v53  ;;  %v1525_v4 = vadd.f32 1.0, %v2361_v59  ;;  %v2163_v24 = vadd.f32 %v3203_v54, %v3131_v8 }
 0x276   : > { %v1588_v3 = vmul.f32 %v1524_v32, %v1332_v46  ;;  %2368 = verf.f32 %v1401_v58  ;;  %v1404_v49 = vmul.f32 0.70710677, %v3261_v33  ;;  %v3279_v13 = vpop.f32.mrb[19].mxu0  ;;  %v1587_v36 = vmul.f32 %v1523_v63, %v1331_v61 }
 0x277   : > { %v3275_v42 = vpop.f32.mrb[18].mxu1  ;;  %v1334_v16 = vmul.f32 0.5, %v3213_v1  ;;  %2370 = verf.f32 %v1402_v2  ;;  %v1403_v37 = vmul.f32 0.70710677, %v3263_v38  ;;  %v1589_v5 = vmul.f32 %v1525_v4, %v1333_v0 }
 0x278   : > { %v3281_v14 = vpop.f32.mrb[19].mxu1  ;;  %1652 = vst [vmem:[%s3181_s7 + $0x70] sm:$0xff] %v1588_v3  ;;  %2372 = verf.f32 %v1404_v49  ;;  %v3286_v17 = vmul.f32 0.1, %v2162_v51  ;;  %v3288_v21 = vmul.f32 0.1, %v2131_v52  ;;  %v2132_v1 = vadd.f32 %v3205_v57, %v3133_v9 }
 0x279   : > { %v3290_v22 = vpop.f32.mrb[20].mxu0  ;;  %v2363_v23 = vpop.eup %2362  ;;  %1651 = vst [vmem:[%s3181_s7 + $0x68] sm:$0xff] %v1587_v36  ;;  %2374 = verf.f32 %v1403_v37  ;;  %v2164_v25 = vadd.f32 %v3210_v60, %v3135_v10  ;;  %1653 = vst [vmem:[%s3181_s7 + $0x78] sm:$0xff] %v1589_v5  ;;  %v1336_v31 = vmul.f32 0.5, %v3215_v6  ;;  %v1335_v34 = vmul.f32 0.5, %v3217_v11 }
 0x27a   : > { %v3301_v28 = vpop.f32.mrb[21].mxu0  ;;  %v2365_v29 = vpop.eup %2364  ;;  %v1526_v30 = vadd.f32 1.0, %v2363_v23  ;;  %v1405_v35 = vmul.f32 0.70710677, %v3286_v17  ;;  %v1406_v57 = vmul.f32 0.70710677, %v3288_v21  ;;  %v2133_v40 = vadd.f32 %v3219_v12, %v3129_v7 }
 0x27b   : > { %v3299_v56 = vpop.f32.mrb[20].mxu1  ;;  %v1528_v39 = vadd.f32 1.0, %v2365_v29  ;;  %v1280_v60 = vmul.f32 0.1, %v2163_v24  ;;  %v3312_v18 = vmul.f32 0.1, %v2132_v1  ;;  %v2166_v3 = vadd.f32 %v3231_v26, %v3135_v10 }
 0x27c   : > { %v3307_v54 = vpop.f32.mrb[21].mxu1  ;;  %v2367_v15 = vpop.eup %2366  ;;  %v1590_v41 = vmul.f32 %v1526_v30, %v1334_v16  ;;  %2376 = verf.f32 %v1405_v35  ;;  %v3314_v6 = vmul.f32 0.1, %v2164_v25  ;;  %v1337_v51 = vmul.f32 0.5, %v3254_v47 }
 0x27d   : > { %v3316_v11 = vpop.f32.mrb[22].mxu0  ;;  %v1592_v46 = vmul.f32 %v1528_v39, %v1336_v31  ;;  %v1527_v27 = vadd.f32 1.0, %v2367_v15  ;;  %2378 = verf.f32 %v1406_v57  ;;  %v1338_v12 = vmul.f32 0.5, %v3259_v50 }
 0x27e   : > { %v3321_v53 = vpop.f32.mrb[23].mxu0  ;;  %1654 = vst [vmem:[%s3181_s7 + $0x80] sm:$0xff] %v1590_v41  ;;  %v1340_v32 = vmul.f32 0.5, %v3261_v33  ;;  %v1408_v58 = vmul.f32 0.70710677, %v1280_v60  ;;  %v2165_v47 = vadd.f32 %v3224_v19, %v3131_v8  ;;  %v1339_v50 = vmul.f32 0.5, %v3263_v38 }
 0x27f   : > { %v3319_v44 = vpop.f32.mrb[22].mxu1  ;;  %v1407_v52 = vmul.f32 0.70710677, %v3312_v18  ;;  %1656 = vst [vmem:[%s3181_s7 + $0x90] sm:$0xff] %v1592_v46  ;;  %v1591_v59 = vmul.f32 %v1527_v27, %v1335_v34  ;;  %v1409_v61 = vmul.f32 0.70710677, %v3314_v6  ;;  %v2134_v33 = vadd.f32 %v3226_v20, %v3133_v9 }
 0x280   : > { %v3329_v63 = vmul.f32 0.1, %v2133_v40  ;;  %v3333_v0 = vpop.f32.mrb[23].mxu1  ;;  %v2369_v2 = vpop.eup %2368  ;;  %2380 = verf.f32 %v1408_v58  ;;  %v2135_v16 = vadd.f32 %v3239_v62, %v3129_v7  ;;  %v3350_v26 = vmul.f32 0.1, %v2165_v47 }
 0x281   : > { %v3340_v4 = vpop.f32.mrb[24].mxu0  ;;  %v2371_v49 = vpop.eup %2370  ;;  %1655 = vst [vmem:[%s3181_s7 + $0x88] sm:$0xff] %v1591_v59  ;;  %v1529_v36 = vadd.f32 1.0, %v2369_v2  ;;  %2382 = verf.f32 %v1407_v52  ;;  %v3352_v23 = vmul.f32 0.1, %v2134_v33  ;;  %v1341_v34 = vmul.f32 0.5, %v3286_v17 }
 0x282   : > { %v1410_v19 = vmul.f32 0.70710677, %v3329_v63  ;;  %v3348_v38 = vpop.f32.mrb[25].mxu0  ;;  %v2373_v5 = vpop.eup %2372  ;;  %v1530_v20 = vadd.f32 1.0, %v2371_v49  ;;  %2384 = verf.f32 %v1409_v61  ;;  %v3356_v62 = vmul.f32 0.1, %v2166_v3 }
 0x283   : > { %v3346_v37 = vpop.f32.mrb[24].mxu1  ;;  %v2375_v1 = vpop.eup %2374  ;;  %v1593_v25 = vmul.f32 %v1529_v36, %v1337_v51  ;;  %v1532_v29 = vadd.f32 1.0, %v2373_v5  ;;  %v1412_v35 = vmul.f32 0.70710677, %v3350_v26  ;;  %v1342_v40 = vmul.f32 0.5, %v3288_v21 }
 0x284   : > { %v3354_v24 = vpop.f32.mrb[25].mxu1  ;;  %2386 = verf.f32 %v1410_v19  ;;  %v1594_v30 = vmul.f32 %v1530_v20, %v1338_v12  ;;  %v1531_v31 = vadd.f32 1.0, %v2375_v1  ;;  %v1344_v15 = vmul.f32 0.5, %v1280_v60 }
 0x285   : > { %v3360_v39 = vpop.f32.mrb[26].mxu0  ;;  %1657 = vst [vmem:[%s3181_s7 + $0x98] sm:$0xff] %v1593_v25  ;;  %v1596_v57 = vmul.f32 %v1532_v29, %v1340_v32  ;;  %v1411_v41 = vmul.f32 0.70710677, %v3352_v23  ;;  %2388 = verf.f32 %v1412_v35  ;;  %v1413_v12 = vmul.f32 0.70710677, %v3356_v62 }
 0x286   : > { %v3367_v27 = vpop.f32.mrb[27].mxu0  ;;  %v2377_v51 = vpop.eup %2376  ;;  %1658 = vst [vmem:[%s3181_s7 + $0xa0] sm:$0xff] %v1594_v30  ;;  %v1595_v17 = vmul.f32 %v1531_v31, %v1339_v50  ;;  %v3371_v58 = vmul.f32 0.1, %v2135_v16  ;;  %v2167_v60 = vadd.f32 %v3248_v43, %v3131_v8  ;;  %v2136_v59 = vadd.f32 %v3250_v45, %v3133_v9 }
 0x287   : > { %v3365_v46 = vpop.f32.mrb[26].mxu1  ;;  %v2379_v32 = vpop.eup %2378  ;;  %1660 = vst [vmem:[%s3181_s7 + $0xb0] sm:$0xff] %v1596_v57  ;;  %v1533_v21 = vadd.f32 1.0, %v2377_v51  ;;  %2390 = verf.f32 %v1411_v41  ;;  %v1343_v47 = vmul.f32 0.5, %v3312_v18  ;;  %v2168_v43 = vadd.f32 %v3256_v48, %v3135_v10 }
 0x288   : > { %v3373_v52 = vpop.f32.mrb[27].mxu1  ;;  %1659 = vst [vmem:[%s3181_s7 + $0xa8] sm:$0xff] %v1595_v17  ;;  %v1534_v61 = vadd.f32 1.0, %v2379_v32  ;;  %2392 = verf.f32 %v1413_v12  ;;  %v1414_v2 = vmul.f32 0.70710677, %v3371_v58  ;;  %v1345_v16 = vmul.f32 0.5, %v3314_v6 }
 0x289   : > { %v3383_v50 = vpop.f32.mrb[28].mxu0  ;;  %v1597_v33 = vmul.f32 %v1533_v21, %v1341_v34  ;;  %v3385_v3 = vmul.f32 0.1, %v2167_v60  ;;  %v3387_v49 = vmul.f32 0.1, %v2136_v59  ;;  %v2137_v5 = vadd.f32 %v3270_v55, %v3129_v7 }
 0x28a   : > { %v3393_v36 = vpop.f32.mrb[29].mxu0  ;;  %v2381_v18 = vpop.eup %2380  ;;  %v1598_v19 = vmul.f32 %v1534_v61, %v1342_v40  ;;  %2394 = verf.f32 %v1414_v2  ;;  %v1346_v48 = vmul.f32 0.5, %v3329_v63  ;;  %v2169_v30 = vadd.f32 %v3275_v42, %v3131_v8 }
 0x28b   : > { %v3391_v45 = vpop.f32.mrb[28].mxu1  ;;  %v2383_v1 = vpop.eup %2382  ;;  %1661 = vst [vmem:[%s3181_s7 + $0xb8] sm:$0xff] %v1597_v33  ;;  %v1536_v25 = vadd.f32 1.0, %v2381_v18  ;;  %v1416_v29 = vmul.f32 0.70710677, %v3385_v3  ;;  %v2138_v55 = vadd.f32 %v3279_v13, %v3133_v9  ;;  %v1348_v21 = vmul.f32 0.5, %v3350_v26 }
 0x28c   : > { %v3398_v20 = vpop.f32.mrb[29].mxu1  ;;  %v2385_v31 = vpop.eup %2384  ;;  %1662 = vst [vmem:[%s3181_s7 + $0xc0] sm:$0xff] %v1598_v19  ;;  %v1535_v34 = vadd.f32 1.0, %v2383_v1  ;;  %v1415_v6 = vmul.f32 0.70710677, %v3387_v49  ;;  %v2170_v18 = vadd.f32 %v3281_v14, %v3135_v10 }
 0x28d   : > { %v1289_v35 = vmul.f32 0.1, %v2168_v43  ;;  %v3409_v57 = vpop.f32.mrb[30].mxu0  ;;  %v1600_v41 = vmul.f32 %v1536_v25, %v1344_v15  ;;  %v1537_v63 = vadd.f32 1.0, %v2385_v31  ;;  %2396 = verf.f32 %v1416_v29 }
 0x28e   : > { %v2387_v40 = vpop.eup %2386  ;;  %v3411_v51 = vmul.f32 0.1, %v2137_v5  ;;  %v3415_v17 = vpop.f32.mrb[31].mxu0  ;;  %v1599_v12 = vmul.f32 %v1535_v34, %v1343_v47  ;;  %2398 = verf.f32 %v1415_v6  ;;  %v1347_v15 = vmul.f32 0.5, %v3352_v23 }
 0x28f   : > { %v3413_v42 = vpop.f32.mrb[30].mxu1  ;;  %v1538_v32 = vadd.f32 1.0, %v2387_v40  ;;  %1664 = vst [vmem:[%s3181_s7 + $0xd0] sm:$0xff] %v1600_v41  ;;  %v1601_v60 = vmul.f32 %v1537_v63, %v1345_v16  ;;  %v1417_v59 = vmul.f32 0.70710677, %v1289_v35  ;;  %v2389_v2 = vpop.eup %2388  ;;  %v2139_v16 = vadd.f32 %v3290_v22, %v3129_v7 }
 0x290   : > { %v3418_v13 = vpop.f32.mrb[31].mxu1  ;;  %v1418_v61 = vmul.f32 0.70710677, %v3411_v51  ;;  %1663 = vst [vmem:[%s3181_s7 + $0xc8] sm:$0xff] %v1599_v12  ;;  %v1292_v43 = vmul.f32 0.1, %v2169_v30  ;;  %v2171_v23 = vadd.f32 %v3299_v56, %v3131_v8 }
 0x291   : > { %v1602_v33 = vmul.f32 %v1538_v32, %v1346_v48  ;;  %v1291_v47 = vmul.f32 0.1, %v2138_v55  ;;  %v2391_v26 = vpop.eup %2390  ;;  %1665 = vst [vmem:[%s3181_s7 + $0xd8] sm:$0xff] %v1601_v60  ;;  %v1540_v19 = vadd.f32 1.0, %v2389_v2  ;;  %2400 = verf.f32 %v1417_v59 }
 0x292   : > { %v2393_v5 = vpop.eup %2392  ;;  %v1539_v1 = vadd.f32 1.0, %v2391_v26  ;;  %v1349_v25 = vmul.f32 0.5, %v3356_v62  ;;  %2402 = verf.f32 %v1418_v61  ;;  %v1420_v48 = vmul.f32 0.70710677, %v1292_v43 }
 0x293   : > { %1666 = vst [vmem:[%s3181_s7 + $0xe0] sm:$0xff] %v1602_v33  ;;  %v1604_v14 = vmul.f32 %v1540_v19, %v1348_v21  ;;  %v1541_v29 = vadd.f32 1.0, %v2393_v5  ;;  %v1350_v30 = vmul.f32 0.5, %v3371_v58  ;;  %v1419_v31 = vmul.f32 0.70710677, %v1291_v47 }
 0x294   : > { %v2395_v34 = vpop.eup %2394  ;;  %v1603_v22 = vmul.f32 %v1539_v1, %v1347_v15  ;;  %2404 = verf.f32 %v1420_v48  ;;  %v1293_v6 = vmul.f32 0.1, %v2170_v18  ;;  %v3434_v56 = vmul.f32 0.1, %v2139_v16 }
 0x295   : > { %1668 = vst [vmem:[%s3181_s7 + $0xf0] sm:$0xff] %v1604_v14  ;;  %v1605_v55 = vmul.f32 %v1541_v29, %v1349_v25  ;;  %v1542_v40 = vadd.f32 1.0, %v2395_v34  ;;  %2406 = verf.f32 %v1419_v31  ;;  %v3437_v62 = vmul.f32 0.1, %v2171_v23 }
 0x296   : > { %1667 = vst [vmem:[%s3181_s7 + $0xe8] sm:$0xff] %v1603_v22  ;;  %v1352_v41 = vmul.f32 0.5, %v3385_v3  ;;  %v1351_v58 = vmul.f32 0.5, %v3387_v49  ;;  %v1421_v63 = vmul.f32 0.70710677, %v1293_v6  ;;  %v1353_v60 = vmul.f32 0.5, %v1289_v35 }
 0x297   : > { %v1422_v12 = vmul.f32 0.70710677, %v3434_v56  ;;  %v2397_v32 = vpop.eup %2396  ;;  %1669 = vst [vmem:[%s3181_s7 + $0xf8] sm:$0xff] %v1605_v55  ;;  %v1606_v21 = vmul.f32 %v1542_v40, %v1350_v30  ;;  %v1424_v15 = vmul.f32 0.70710677, %v3437_v62  ;;  %v2140_v59 = vadd.f32 %v3301_v28, %v3133_v9 }
 0x298   : > { %v2399_v61 = vpop.eup %2398  ;;  %v1544_v2 = vadd.f32 1.0, %v2397_v32  ;;  %2408 = verf.f32 %v1421_v63  ;;  %v2172_v3 = vadd.f32 %v3307_v54, %v3135_v10  ;;  %v2141_v49 = vadd.f32 %v3316_v11, %v3129_v7 }
 0x299   : > { %1670 = vst [vmem:[%s3181_s7 + $0x100] sm:$0xff] %v1606_v21  ;;  %v1543_v33 = vadd.f32 1.0, %v2399_v61  ;;  %2410 = verf.f32 %v1422_v12  ;;  %v1295_v18 = vmul.f32 0.1, %v2140_v59  ;;  %v2173_v35 = vadd.f32 %v3319_v44, %v3131_v8 }
 0x29a   : > { %v1608_v26 = vmul.f32 %v1544_v2, %v1352_v41  ;;  %2412 = verf.f32 %v1424_v15  ;;  %v1297_v28 = vmul.f32 0.1, %v2172_v3  ;;  %v3454_v19 = vmul.f32 0.1, %v2141_v49 }
 0x29b   : > { %v2401_v16 = vpop.eup %2400  ;;  %v1607_v23 = vmul.f32 %v1543_v33, %v1351_v58  ;;  %v1354_v54 = vmul.f32 0.5, %v3411_v51  ;;  %v1423_v5 = vmul.f32 0.70710677, %v1295_v18  ;;  %v3457_v11 = vmul.f32 0.1, %v2173_v35 }
 0x29c   : > { %v2403_v1 = vpop.eup %2402  ;;  %1672 = vst [vmem:[%s3181_s7 + $0x110] sm:$0xff] %v1608_v26  ;;  %v1545_v25 = vadd.f32 1.0, %v2401_v16  ;;  %v1356_v48 = vmul.f32 0.5, %v1292_v43  ;;  %v1355_v14 = vmul.f32 0.5, %v1291_v47  ;;  %v1425_v29 = vmul.f32 0.70710677, %v1297_v28 }
 0x29d   : > { %1671 = vst [vmem:[%s3181_s7 + $0x108] sm:$0xff] %v1607_v23  ;;  %v1546_v44 = vadd.f32 1.0, %v2403_v1  ;;  %v1357_v30 = vmul.f32 0.5, %v1293_v6  ;;  %2414 = verf.f32 %v1423_v5  ;;  %v1426_v31 = vmul.f32 0.70710677, %v3454_v19 }
 0x29e   : > { %v2405_v34 = vpop.eup %2404  ;;  %v1609_v22 = vmul.f32 %v1545_v25, %v1353_v60  ;;  %2416 = verf.f32 %v1425_v29  ;;  %v1428_v51 = vmul.f32 0.70710677, %v3457_v11  ;;  %v2142_v55 = vadd.f32 %v3321_v53, %v3133_v9 }
 0x29f   : > { %v2407_v40 = vpop.eup %2406  ;;  %v1610_v43 = vmul.f32 %v1546_v44, %v1354_v54  ;;  %v1548_v47 = vadd.f32 1.0, %v2405_v34  ;;  %2418 = verf.f32 %v1426_v31  ;;  %v2174_v41 = vadd.f32 %v3333_v0, %v3135_v10 }
 0x2a0   : > { %1673 = vst [vmem:[%s3181_s7 + $0x118] sm:$0xff] %v1609_v22  ;;  %v1547_v6 = vadd.f32 1.0, %v2407_v40  ;;  %2420 = verf.f32 %v1428_v51  ;;  %v1299_v58 = vmul.f32 0.1, %v2142_v55  ;;  %v2143_v63 = vadd.f32 %v3340_v4, %v3129_v7 }
 0x2a1   : > { %1674 = vst [vmem:[%s3181_s7 + $0x120] sm:$0xff] %v1610_v43  ;;  %v1612_v12 = vmul.f32 %v1548_v47, %v1356_v48  ;;  %v1358_v53 = vmul.f32 0.5, %v3434_v56  ;;  %v1301_v32 = vmul.f32 0.1, %v2174_v41  ;;  %v2175_v21 = vadd.f32 %v3346_v37, %v3131_v8 }
 0x2a2   : > { %v2409_v60 = vpop.eup %2408  ;;  %v1611_v15 = vmul.f32 %v1547_v6, %v1355_v14  ;;  %v1427_v0 = vmul.f32 0.70710677, %v1299_v58  ;;  %v3474_v59 = vmul.f32 0.1, %v2143_v63  ;;  %v2144_v61 = vadd.f32 %v3348_v38, %v3133_v9 }
 0x2a3   : > { %v2411_v2 = vpop.eup %2410  ;;  %1676 = vst [vmem:[%s3181_s7 + $0x130] sm:$0xff] %v1612_v12  ;;  %v1549_v4 = vadd.f32 1.0, %v2409_v60  ;;  %v1360_v3 = vmul.f32 0.5, %v3437_v62  ;;  %v1429_v49 = vmul.f32 0.70710677, %v1301_v32  ;;  %v1359_v35 = vmul.f32 0.5, %v1295_v18 }
 0x2a4   : > { %v3480_v33 = vmul.f32 0.1, %v2175_v21  ;;  %v2413_v56 = vpop.eup %2412  ;;  %1675 = vst [vmem:[%s3181_s7 + $0x128] sm:$0xff] %v1611_v15  ;;  %v1550_v37 = vadd.f32 1.0, %v2411_v2  ;;  %2422 = verf.f32 %v1427_v0  ;;  %v1430_v26 = vmul.f32 0.70710677, %v3474_v59 }
 0x2a5   : > { %v1613_v16 = vmul.f32 %v1549_v4, %v1357_v30  ;;  %v1552_v23 = vadd.f32 1.0, %v2413_v56  ;;  %v1361_v38 = vmul.f32 0.5, %v1297_v28  ;;  %2424 = verf.f32 %v1429_v49 }
 0x2a6   : > { %v1614_v54 = vmul.f32 %v1550_v37, %v1358_v53  ;;  %2426 = verf.f32 %v1430_v26  ;;  %v1432_v62 = vmul.f32 0.70710677, %v3480_v33  ;;  %v3485_v5 = vmul.f32 0.1, %v2144_v61 }
 0x2a7   : > { %v2415_v1 = vpop.eup %2414  ;;  %1677 = vst [vmem:[%s3181_s7 + $0x138] sm:$0xff] %v1613_v16  ;;  %v1616_v25 = vmul.f32 %v1552_v23, %v1360_v3  ;;  %v2176_v18 = vadd.f32 %v3354_v24, %v3135_v10  ;;  %v2145_v48 = vadd.f32 %v3360_v39, %v3129_v7  ;;  %v2177_v28 = vadd.f32 %v3365_v46, %v3131_v8 }
 0x2a8   : > { %v2417_v14 = vpop.eup %2416  ;;  %1678 = vst [vmem:[%s3181_s7 + $0x140] sm:$0xff] %v1614_v54  ;;  %v1551_v29 = vadd.f32 1.0, %v2415_v1  ;;  %v1362_v44 = vmul.f32 0.5, %v3454_v19  ;;  %2428 = verf.f32 %v1432_v62  ;;  %v1431_v30 = vmul.f32 0.70710677, %v3485_v5 }
 0x2a9   : > { %v2419_v31 = vpop.eup %2418  ;;  %1680 = vst [vmem:[%s3181_s7 + $0x150] sm:$0xff] %v1616_v25  ;;  %v1553_v34 = vadd.f32 1.0, %v2417_v14  ;;  %v3498_v22 = vmul.f32 0.1, %v2176_v18  ;;  %v3500_v24 = vmul.f32 0.1, %v2145_v48  ;;  %v2146_v39 = vadd.f32 %v3367_v27, %v3133_v9 }
 0x2aa   : > { %v2421_v46 = vpop.eup %2420  ;;  %v1615_v51 = vmul.f32 %v1551_v29, %v1359_v35  ;;  %v1554_v55 = vadd.f32 1.0, %v2419_v31  ;;  %2430 = verf.f32 %v1431_v30  ;;  %v3504_v19 = vmul.f32 0.1, %v2177_v28 }
 0x2ab   : > { %v1617_v40 = vmul.f32 %v1553_v34, %v1361_v38  ;;  %v1364_v43 = vmul.f32 0.5, %v3457_v11  ;;  %v1556_v47 = vadd.f32 1.0, %v2421_v46  ;;  %v1433_v41 = vmul.f32 0.70710677, %v3498_v22 }
 0x2ac   : > { %1679 = vst [vmem:[%s3181_s7 + $0x148] sm:$0xff] %v1615_v51  ;;  %v1618_v6 = vmul.f32 %v1554_v55, %v1362_v44  ;;  %v1363_v63 = vmul.f32 0.5, %v1299_v58  ;;  %v1365_v12 = vmul.f32 0.5, %v1301_v32  ;;  %v1434_v27 = vmul.f32 0.70710677, %v3500_v24 }
 0x2ad   : > { %1681 = vst [vmem:[%s3181_s7 + $0x158] sm:$0xff] %v1617_v40  ;;  %v1620_v53 = vmul.f32 %v1556_v47, %v1364_v43  ;;  %2432 = verf.f32 %v1433_v41  ;;  %v1436_v21 = vmul.f32 0.70710677, %v3504_v19  ;;  %v3512_v60 = vmul.f32 0.1, %v2146_v39 }
 0x2ae   : > { %v2423_v15 = vpop.eup %2422  ;;  %1682 = vst [vmem:[%s3181_s7 + $0x160] sm:$0xff] %v1618_v6  ;;  %2434 = verf.f32 %v1434_v27  ;;  %v2178_v11 = vadd.f32 %v3373_v52, %v3135_v10  ;;  %v2147_v0 = vadd.f32 %v3383_v50, %v3129_v7  ;;  %v2179_v58 = vadd.f32 %v3391_v45, %v3131_v8 }
 0x2af   : > { %v2425_v32 = vpop.eup %2424  ;;  %1684 = vst [vmem:[%s3181_s7 + $0x170] sm:$0xff] %v1620_v53  ;;  %v1555_v61 = vadd.f32 1.0, %v2423_v15  ;;  %v1366_v2 = vmul.f32 0.5, %v3474_v59  ;;  %2436 = verf.f32 %v1436_v21  ;;  %v1435_v4 = vmul.f32 0.70710677, %v3512_v60 }
 0x2b0   : > { %v2427_v3 = vpop.eup %2426  ;;  %v1557_v49 = vadd.f32 1.0, %v2425_v32  ;;  %v3524_v56 = vmul.f32 0.1, %v2178_v11  ;;  %v3526_v52 = vmul.f32 0.1, %v2147_v0  ;;  %v2148_v50 = vadd.f32 %v3393_v36, %v3133_v9 }
 0x2b1   : > { %v1619_v45 = vmul.f32 %v1555_v61, %v1363_v63  ;;  %v1558_v37 = vadd.f32 1.0, %v2427_v3  ;;  %2438 = verf.f32 %v1435_v4  ;;  %v3530_v35 = vmul.f32 0.1, %v2179_v58 }
 0x2b2   : > { %v2429_v59 = vpop.eup %2428  ;;  %v1621_v26 = vmul.f32 %v1557_v49, %v1365_v12  ;;  %v1368_v16 = vmul.f32 0.5, %v3480_v33  ;;  %v1437_v23 = vmul.f32 0.70710677, %v3524_v56  ;;  %v1367_v62 = vmul.f32 0.5, %v3485_v5 }
 0x2b3   : > { %1683 = vst [vmem:[%s3181_s7 + $0x168] sm:$0xff] %v1619_v45  ;;  %v1622_v38 = vmul.f32 %v1558_v37, %v1366_v2  ;;  %v1560_v54 = vadd.f32 1.0, %v2429_v59  ;;  %v1438_v1 = vmul.f32 0.70710677, %v3526_v52  ;;  %v1440_v25 = vmul.f32 0.70710677, %v3530_v35 }
 0x2b4   : > { %v2431_v36 = vpop.eup %2430  ;;  %1685 = vst [vmem:[%s3181_s7 + $0x178] sm:$0xff] %v1621_v26  ;;  %2440 = verf.f32 %v1437_v23  ;;  %v3539_v18 = vmul.f32 0.1, %v2148_v50  ;;  %v2180_v33 = vadd.f32 %v3398_v20, %v3135_v10  ;;  %v2149_v5 = vadd.f32 %v3409_v57, %v3129_v7 }
 0x2b5   : > { %1686 = vst [vmem:[%s3181_s7 + $0x180] sm:$0xff] %v1622_v38  ;;  %v1624_v48 = vmul.f32 %v1560_v54, %v1368_v16  ;;  %v1559_v28 = vadd.f32 1.0, %v2431_v36  ;;  %2442 = verf.f32 %v1438_v1  ;;  %v1369_v14 = vmul.f32 0.5, %v3498_v22 }
 0x2b6   : > { %2444 = verf.f32 %v1440_v25  ;;  %v1439_v29 = vmul.f32 0.70710677, %v3539_v18  ;;  %v1313_v44 = vmul.f32 0.1, %v2180_v33  ;;  %v1314_v34 = vmul.f32 0.1, %v2149_v5 }
 0x2b7   : > { %v2433_v30 = vpop.eup %2432  ;;  %1688 = vst [vmem:[%s3181_s7 + $0x190] sm:$0xff] %v1624_v48  ;;  %v1623_v31 = vmul.f32 %v1559_v28, %v1367_v62  ;;  %v2181_v20 = vadd.f32 %v3413_v42, %v3131_v8  ;;  %v2150_v39 = vadd.f32 %v3415_v17, %v3133_v9  ;;  %v1370_v7 = vmul.f32 0.5, %v3500_v24 }
 0x2b8   : > { %v2435_v46 = vpop.eup %2434  ;;  %v1561_v51 = vadd.f32 1.0, %v2433_v30  ;;  %2446 = verf.f32 %v1439_v29  ;;  %v1441_v57 = vmul.f32 0.70710677, %v1313_v44  ;;  %v1372_v40 = vmul.f32 0.5, %v3504_v19 }
 0x2b9   : > { %v2437_v22 = vpop.eup %2436  ;;  %1687 = vst [vmem:[%s3181_s7 + $0x188] sm:$0xff] %v1623_v31  ;;  %v1562_v55 = vadd.f32 1.0, %v2435_v46  ;;  %v1442_v43 = vmul.f32 0.70710677, %v1314_v34  ;;  %v1316_v47 = vmul.f32 0.1, %v2181_v20  ;;  %v2182_v19 = vadd.f32 %v3418_v13, %v3135_v10 }
 0x2ba   : > { %v1625_v41 = vmul.f32 %v1561_v51, %v1369_v14  ;;  %v1564_v8 = vadd.f32 1.0, %v2437_v22  ;;  %2448 = verf.f32 %v1441_v57  ;;  %v1315_v9 = vmul.f32 0.1, %v2150_v39 }
 0x2bb   : > { %v2439_v42 = vpop.eup %2438  ;;  %v1626_v17 = vmul.f32 %v1562_v55, %v1370_v7  ;;  %2450 = verf.f32 %v1442_v43  ;;  %v1444_v24 = vmul.f32 0.70710677, %v1316_v47  ;;  %v1371_v63 = vmul.f32 0.5, %v3512_v60 }
 0x2bc   : > { %1689 = vst [vmem:[%s3181_s7 + $0x198] sm:$0xff] %v1625_v41  ;;  %v1628_v6 = vmul.f32 %v1564_v8, %v1372_v40  ;;  %v1563_v12 = vadd.f32 1.0, %v2439_v42  ;;  %v1443_v27 = vmul.f32 0.70710677, %v1315_v9  ;;  %v1373_v11 = vmul.f32 0.5, %v3524_v56 }
 0x2bd   : > { %1690 = vst [vmem:[%s3181_s7 + $0x1a0] sm:$0xff] %v1626_v17  ;;  %2452 = verf.f32 %v1444_v24  ;;  %v1317_v58 = vmul.f32 0.1, %v2182_v19  ;;  %v1374_v60 = vmul.f32 0.5, %v3526_v52  ;;  %v1376_v10 = vmul.f32 0.5, %v3530_v35 }
 0x2be   : > { %v2441_v53 = vpop.eup %2440  ;;  %1692 = vst [vmem:[%s3181_s7 + $0x1b0] sm:$0xff] %v1628_v6  ;;  %v1627_v21 = vmul.f32 %v1563_v12, %v1371_v63  ;;  %2454 = verf.f32 %v1443_v27  ;;  %v1375_v56 = vmul.f32 0.5, %v3539_v18  ;;  %v1377_v26 = vmul.f32 0.5, %v1313_v44 }
 0x2bf   : > { %v2443_v15 = vpop.eup %2442  ;;  %v1565_v0 = vadd.f32 1.0, %v2441_v53  ;;  %v1445_v4 = vmul.f32 0.70710677, %v1317_v58  ;;  %v1378_v16 = vmul.f32 0.5, %v1314_v34  ;;  %v1380_v36 = vmul.f32 0.5, %v1316_v47 }
 0x2c0   : > { %v2445_v32 = vpop.eup %2444  ;;  %1691 = vst [vmem:[%s3181_s7 + $0x1a8] sm:$0xff] %v1627_v21  ;;  %v1566_v61 = vadd.f32 1.0, %v2443_v15  ;;  %v1379_v18 = vmul.f32 0.5, %v1315_v9  ;;  %v1381_v14 = vmul.f32 0.5, %v1317_v58 }
 0x2c1   : > { %v1629_v2 = vmul.f32 %v1565_v0, %v1373_v11  ;;  %v1568_v13 = vadd.f32 1.0, %v2445_v32  ;;  %2456 = verf.f32 %v1445_v4 }
 0x2c2   : > { %v2447_v3 = vpop.eup %2446  ;;  %v1630_v49 = vmul.f32 %v1566_v61, %v1374_v60 }
 0x2c3   : > { %1693 = vst [vmem:[%s3181_s7 + $0x1b8] sm:$0xff] %v1629_v2  ;;  %v1632_v50 = vmul.f32 %v1568_v13, %v1376_v10  ;;  %v1567_v45 = vadd.f32 1.0, %v2447_v3 }
 0x2c4   : > { %v2449_v37 = vpop.eup %2448  ;;  %1694 = vst [vmem:[%s3181_s7 + $0x1c0] sm:$0xff] %v1630_v49 }
 0x2c5   : > { %v2451_v52 = vpop.eup %2450  ;;  %1696 = vst [vmem:[%s3181_s7 + $0x1d0] sm:$0xff] %v1632_v50  ;;  %v1631_v59 = vmul.f32 %v1567_v45, %v1375_v56  ;;  %v1569_v35 = vadd.f32 1.0, %v2449_v37 }
 0x2c6   : > { %v1570_v23 = vadd.f32 1.0, %v2451_v52 }
 0x2c7   : > { %v2453_v38 = vpop.eup %2452  ;;  %1695 = vst [vmem:[%s3181_s7 + $0x1c8] sm:$0xff] %v1631_v59  ;;  %v1633_v54 = vmul.f32 %v1569_v35, %v1377_v26 }
 0x2c8   : > { %v2455_v62 = vpop.eup %2454  ;;  %v1634_v1 = vmul.f32 %v1570_v23, %v1378_v16  ;;  %v1572_v25 = vadd.f32 1.0, %v2453_v38 }
 0x2c9   : > { %1697 = vst [vmem:[%s3181_s7 + $0x1d8] sm:$0xff] %v1633_v54  ;;  %v1571_v33 = vadd.f32 1.0, %v2455_v62 }
 0x2ca   : > { %1698 = vst [vmem:[%s3181_s7 + $0x1e0] sm:$0xff] %v1634_v1  ;;  %v1636_v48 = vmul.f32 %v1572_v25, %v1380_v36 }
 0x2cb   : > { %v1635_v28 = vmul.f32 %v1571_v33, %v1379_v18  ;;  %v2457_v5 = vpop.eup %2456 }
 0x2cc   : > { %1700 = vst [vmem:[%s3181_s7 + $0x1f0] sm:$0xff] %v1636_v48  ;;  %v1573_v29 = vadd.f32 1.0, %v2457_v5 }
 0x2cd   : > { %1699 = vst [vmem:[%s3181_s7 + $0x1e8] sm:$0xff] %v1635_v28 }
 0x2ce   : > { %v1637_v44 = vmul.f32 %v1573_v29, %v1381_v14 }
 0x2d0   : > { %1701 = vst [vmem:[%s3181_s7 + $0x1f8] sm:$0xff] %v1637_v44 }
 0x2d1   : > { %2559 = shalt.err (!%p2556_p8)
}
 0x2d2   : > { %s2560_s30 = scalar_lea.hbm %s3580_s11, 8192  ;;  %s2564_s1 = scalar_lea.hbm %s3635_s3, 16384 }
 0x2d3   : > { %p2561_p10 = scmp.ne.s32.totalorder %s3580_s11, %s2560_s30  ;;  %p2565_p4 = scmp.lt.u32.totalorder %s3580_s11, %s3635_s3 }
 0x2d4   : > { %p2566_p2 = scmp.lt.u32.totalorder %s2564_s1, %s2560_s30  ;;  %p2568_p3 = scmp.lt.u32.totalorder %s2560_s30, %s3580_s11 }
 0x2d5   : > { %p2562_p13 = pnand %p2561_p10, %p3665_p5 }
 0x2d6   : > { %p2567_p11 = por %p2566_p2, %p2565_p4 }
 0x2d7   : > { %p2563_p7 = pneg %p2562_p13 }
 0x2d8   : > { %p2569_p1 = por %p2568_p3, %p2567_p11 }
 0x2da   : > { %p2570_p12 = pnand %p2569_p1, %p2563_p7 }
 0x2dc   : > { %2573 = shalt.err (!%p2570_p12)
}
 0x2dd   : > { %s2640_s26 = smov 512   ;;  %s2641_s28 = smov 1024  }
 0x2de   : > { %s2642_s7 = smov 32  }
 0x2df   : > { %2255 = dma.vmem_to_hbm [thread:$0]  (%p3665_p5), %s3582_s21, 8192, %s3580_s11, %s1703_s20, %s2640_s26, %s2641_s28, %s2642_s7  }
 0x2e0 PF: > { %s1734_s8 = sand.u32 1, %s2612_s12   ;;  %p3666_p0 = scmp.ne.s32.totalorder %s3653_s4, 0 }
 0x2e1   : > { %p3667_p9 = scmp.ge.s32.totalorder %s2632_s17, 2  ;;  %s1735_s27 = scalar_lea.sflag [#allocation4], %s1734_s8 }
 0x2e3   : > { %p2269_p6 = pnand %p3667_p9, %p3666_p0 }
 0x2e5   : > { %2607 = dma.done.wait (!%p2269_p6), %s1735_s27, 8192  }
 0x2e6   : > { %2609 = vsyncadd (!%p2269_p6), %s1735_s27, 4294959104  ;;  %s20_s17 = sadd.s32 1, %s2632_s17   ;;  %s3668_s29 = sld [smem:[#allocation12_spill]] }
 0x2e7   : > { %p17_p8 = scmp.ge.s32.totalorder %s20_s17, 4   ;;  %s3669_s12 = smov %s2616_s13 }
 0x2e8   : > { %s3670_s13 = smov %s2620_s14  ;;  %s3671_s14 = smov %s2714_s24 }
 0x2e9   : > { %s3672_s15 = smov %s2628_s16  ;;  %19 = sbr.rel (!%p17_p8) target bundleno = 9 (0x9), region = 94 }
 0x2ec   : > { %s3673_s16 = smov %s3668_s29 }
 0x2f0   :  { %1740 = vsyncpa [#allocation3], 1 }
 0x2f1   :  { %1742 = vsyncpa [#allocation3 + $0x1], 1 }
 0x2f2   :  { %1743 = vsyncpa [#allocation6], 1 }
 0x2f3   :  { %1745 = vsyncpa [#allocation6 + $0x1], 1 }
 0x2f4   :  { %1746 = vsyncpa [#allocation4], 1 }
 0x2f5   :  { %1748 = vsyncpa [#allocation4 + $0x1], 1 }

</bundles_post_ra>
